<compile_context>
chip_gen: v6e
topology: v6e:2x2x1
jax: 0.10.0
libtpu: 0.0.40
codegen_flags: <defaults>
</compile_context>

<pallas_src>
import functools

import numpy as np
import jax
import jax.numpy as jnp
from jax.experimental import pallas as pl
from jax.experimental.pallas import tpu as pltpu


# ---------------------------------------------------------------------------
# Host-side constant packing (runs once, outside jit, in numpy)
# ---------------------------------------------------------------------------

def _shift_mats(n):
    """(2, n, n): [0] row h <- row h-1 (kh=0 tap), [1] row h <- row h+1 (kh=2 tap)."""
    m = np.zeros((2, n, n), np.float32)
    for h in range(1, n):
        m[0, h, h - 1] = 1.0
        m[1, h - 1, h] = 1.0
    return m


def _row_select(n_out, n_in):
    """(2, n_out, n_in): [p] picks rows 2*i + p (for 2x2 max-pool row compaction)."""
    m = np.zeros((2, n_out, n_in), np.float32)
    for i in range(n_out):
        m[0, i, 2 * i] = 1.0
        m[1, i, 2 * i + 1] = 1.0
    return m


def _col_select(w_in, w_out, c):
    """(2, w_in*c, w_out*c): [p] picks lane group (2*w2+p), keeping channel identity."""
    m = np.zeros((2, w_in * c, w_out * c), np.float32)
    for w2 in range(w_out):
        for p in range(2):
            w = 2 * w2 + p
            for ch in range(c):
                m[p, w * c + ch, w2 * c + ch] = 1.0
    return m


def _banded_conv3(w, width):
    """Conv2d(Cin->Cout, 3, pad=1) weights as 3 banded matrices (column padding folded in).

    w: (Cout, Cin, 3, 3)  ->  (3, width*Cin, width*Cout) with
    out[kh][u*Cin+ci, x*Cout+co] = w[co, ci, kh, u-x+1].
    """
    cout, cin = w.shape[0], w.shape[1]
    m = np.zeros((3, width * cin, width * cout), np.float32)
    for kh in range(3):
        for x in range(width):
            for kw in range(3):
                u = x - 1 + kw
                if 0 <= u < width:
                    for ci in range(cin):
                        m[kh, u * cin + ci, x * cout:(x + 1) * cout] = w[:, ci, kh, kw]
    return m


def _convt2(w, w_in):
    """ConvTranspose2d(Cin->Cout, 2, stride=2) weights, split by output-row parity kh.

    w: (Cin, Cout, 2, 2)  ->  (2, w_in*Cin, 2*w_in*Cout) with
    out[kh][x*Cin+ci, (2x+kw)*Cout+co] = w[ci, co, kh, kw]  (column interleave folded in).
    """
    cin, cout = w.shape[0], w.shape[1]
    m = np.zeros((2, w_in * cin, 2 * w_in * cout), np.float32)
    for kh in range(2):
        for x in range(w_in):
            for kw in range(2):
                for ci in range(cin):
                    m[kh, x * cin + ci,
                      (2 * x + kw) * cout:(2 * x + kw + 1) * cout] = w[ci, :, kh, kw]
    return m


def _row_place(h, h4):
    """(2, 2, h, h4): [k1,k2] places decoder rows h4 at output rows 4*h4 + 2*k1 + k2."""
    m = np.zeros((2, 2, h, h4), np.float32)
    for k1 in range(2):
        for k2 in range(2):
            for i in range(h4):
                m[k1, k2, 4 * i + 2 * k1 + k2, i] = 1.0
    return m


def prepare_constants(params, H, W):
    assert H % 4 == 0 and W % 4 == 0, "two 2x2 max-pools require H, W divisible by 4"
    w1 = np.asarray(params["enc_w1"], np.float32)   # (16, C0, 3, 3)
    b1 = np.asarray(params["enc_b1"], np.float32)
    w2 = np.asarray(params["enc_w2"], np.float32)   # (4, 16, 3, 3)
    b2 = np.asarray(params["enc_b2"], np.float32)
    wd1 = np.asarray(params["dec_w1"], np.float32)  # (4, 16, 2, 2)
    bd1 = np.asarray(params["dec_b1"], np.float32)
    wd2 = np.asarray(params["dec_w2"], np.float32)  # (16, C0, 2, 2)
    bd2 = np.asarray(params["dec_b2"], np.float32)

    C1 = w1.shape[0]
    C2 = w2.shape[0]
    H2, W2 = H // 2, W // 2
    H4, W4 = H // 4, W // 4

    consts = (
        _shift_mats(H),                 # sh1  (2, H, H)
        _banded_conv3(w1, W),           # w1b  (3, W*C0,  W*C1)
        _row_select(H2, H),             # rs1  (2, H2, H)
        _col_select(W, W2, C1),         # cs1  (2, W*C1,  W2*C1)
        np.tile(b1, W2)[None, :],       # b1t  (1, W2*C1)
        _shift_mats(H2),                # sh2  (2, H2, H2)
        _banded_conv3(w2, W2),          # w2b  (3, W2*C1, W2*C2)
        _row_select(H4, H2),            # rs2  (2, H4, H2)
        _col_select(W2, W4, C2),        # cs2  (2, W2*C2, W4*C2)
        np.tile(b2, W4)[None, :],       # b2t  (1, W4*C2)
        _convt2(wd1, W4),               # g    (2, W4*C2, W2*C1)
        np.tile(bd1, W2)[None, :],      # bd1t (1, W2*C1)
        _convt2(wd2, W2),               # hh   (2, W2*C1, W*C0)
        _row_place(H, H4),              # pm   (2, 2, H, H4)
        np.tile(bd2, W)[None, :],       # bd2t (1, W*C0)
    )
    return tuple(jnp.asarray(c, jnp.float32) for c in consts)


# ---------------------------------------------------------------------------
# The fused kernel: whole autoencoder forward for a block of images per grid step
# ---------------------------------------------------------------------------

def _fused_autoencoder_kernel(x_ref, sh1_ref, w1b_ref, rs1_ref, cs1_ref, b1t_ref,
                              sh2_ref, w2b_ref, rs2_ref, cs2_ref, b2t_ref,
                              g_ref, bd1t_ref, hh_ref, pm_ref, bd2t_ref,
                              o_ref, *, bblk, H, W, C0):
    f32 = jnp.float32

    def mm(a, b):
        return jnp.dot(a, b, preferred_element_type=f32)

    for b in range(bblk):  # static unroll; bblk is small (1-4)
        x0 = x_ref[b]                                                   # (H, W*C0)

        # ---- encoder layer 1: Conv3x3(C0->16) + ReLU + MaxPool2x2 ----
        acc = (mm(mm(sh1_ref[0], x0), w1b_ref[0]) +
               mm(x0, w1b_ref[1]) +
               mm(mm(sh1_ref[1], x0), w1b_ref[2]))                      # (H, W*C1)
        rp = jnp.maximum(mm(rs1_ref[0], acc), mm(rs1_ref[1], acc))      # (H/2, W*C1)
        cp = jnp.maximum(mm(rp, cs1_ref[0]), mm(rp, cs1_ref[1]))        # (H/2, W/2*C1)
        h1 = jnp.maximum(cp + b1t_ref[...], 0.0)   # bias+ReLU commute with max-pool

        # ---- encoder layer 2: Conv3x3(16->4) + ReLU + MaxPool2x2 ----
        acc2 = (mm(mm(sh2_ref[0], h1), w2b_ref[0]) +
                mm(h1, w2b_ref[1]) +
                mm(mm(sh2_ref[1], h1), w2b_ref[2]))                     # (H/2, W/2*C2)
        rp2 = jnp.maximum(mm(rs2_ref[0], acc2), mm(rs2_ref[1], acc2))   # (H/4, W/2*C2)
        cp2 = jnp.maximum(mm(rp2, cs2_ref[0]), mm(rp2, cs2_ref[1]))     # (H/4, W/4*C2)
        lat = jnp.maximum(cp2 + b2t_ref[...], 0.0)                      # latent

        # ---- decoder layer 1: ConvT2x2 s2 (4->16) + ReLU (rows split by parity kh1) ----
        d1_0 = jnp.maximum(mm(lat, g_ref[0]) + bd1t_ref[...], 0.0)      # (H/4, W/2*C1)
        d1_1 = jnp.maximum(mm(lat, g_ref[1]) + bd1t_ref[...], 0.0)

        # ---- decoder layer 2: ConvT2x2 s2 (16->C0); row placement; bias + Sigmoid ----
        pre = (mm(pm_ref[0, 0], mm(d1_0, hh_ref[0])) +
               mm(pm_ref[0, 1], mm(d1_0, hh_ref[1])) +
               mm(pm_ref[1, 0], mm(d1_1, hh_ref[0])) +
               mm(pm_ref[1, 1], mm(d1_1, hh_ref[1])))                   # (H, W*C0)
        z = pre + bd2t_ref[...]
        o_ref[b] = (1.0 / (1.0 + jnp.exp(-z))).astype(o_ref.dtype)      # one dense store


# ---------------------------------------------------------------------------
# Wrapper: one pallas_call for the whole forward
# ---------------------------------------------------------------------------

def autoencoder_forward(consts, x_nchw, *, images_per_step=None):
    B, C0, H, W = x_nchw.shape
    x = x_nchw.astype(jnp.float32)
    if C0 == 1:
        x = x.reshape(B, H, W * C0)                        # free, row-major identical
    else:
        x = jnp.transpose(x, (0, 2, 3, 1)).reshape(B, H, W * C0)

    if images_per_step is None:
        images_per_step = max(1, min(4, B // 2))           # >=2 grid steps when B>=2 (v7x)
        while B % images_per_step:
            images_per_step -= 1
    bblk = images_per_step
    grid = (B // bblk,)

    def _const_spec(a):
        nd = a.ndim
        return pl.BlockSpec(a.shape, lambda n, _nd=nd: (0,) * _nd)     # VMEM-resident

    kern = functools.partial(_fused_autoencoder_kernel, bblk=bblk, H=H, W=W, C0=C0)
    y = pl.pallas_call(
        kern,
        out_shape=jax.ShapeDtypeStruct((B, H, W * C0), jnp.float32),
        grid=grid,
        in_specs=[pl.BlockSpec((bblk, H, W * C0), lambda n: (n, 0, 0))]
                 + [_const_spec(c) for c in consts],
        out_specs=pl.BlockSpec((bblk, H, W * C0), lambda n: (n, 0, 0)),
        compiler_params=pltpu.CompilerParams(dimension_semantics=("parallel",)),
    )(x, *consts)

    y = y.reshape(B, H, W, C0)
    return jnp.transpose(y, (0, 3, 1, 2))


# ---------------------------------------------------------------------------
# Parameter init (PyTorch-style uniform fan-in) and a pure-JAX reference
# ---------------------------------------------------------------------------

def init_params(key, inchannels=1):
    def uni(k, shape, fan_in):
        bound = 1.0 / jnp.sqrt(jnp.float32(fan_in))
        return jax.random.uniform(k, shape, jnp.float32, -bound, bound)

    ks = jax.random.split(key, 8)
    p = {}
    p["enc_w1"] = uni(ks[0], (16, inchannels, 3, 3), inchannels * 9)
    p["enc_b1"] = uni(ks[1], (16,), inchannels * 9)
    p["enc_w2"] = uni(ks[2], (4, 16, 3, 3), 16 * 9)
    p["enc_b2"] = uni(ks[3], (4,), 16 * 9)
    p["dec_w1"] = uni(ks[4], (4, 16, 2, 2), 16 * 4)
    p["dec_b1"] = uni(ks[5], (16,), 16 * 4)
    p["dec_w2"] = uni(ks[6], (16, inchannels, 2, 2), inchannels * 4)
    p["dec_b2"] = uni(ks[7], (inchannels,), inchannels * 4)
    return p


def reference_forward(params, x_nchw):
    hi = jax.lax.Precision.HIGHEST

    def conv3(x, w, b):
        n, c, h, wd = x.shape
        xp = jnp.pad(x, ((0, 0), (0, 0), (1, 1), (1, 1)))
        y = jnp.zeros((n, w.shape[0], h, wd), jnp.float32)
        for kh in range(3):
            for kw in range(3):
                y = y + jnp.einsum('ncij,oc->noij', xp[:, :, kh:kh + h, kw:kw + wd],
                                   w[:, :, kh, kw], precision=hi)
        return y + b[None, :, None, None]

    def pool2(x):
        n, c, h, wd = x.shape
        return x.reshape(n, c, h // 2, 2, wd // 2, 2).max(axis=(3, 5))

    def convt2(x, w, b):
        n, c, h, wd = x.shape
        y = jnp.einsum('ncij,cdhw->ndihjw', x, w, precision=hi)
        y = y.reshape(n, w.shape[1], 2 * h, 2 * wd)
        return y + b[None, :, None, None]

    y = pool2(jax.nn.relu(conv3(x_nchw.astype(jnp.float32),
                                params["enc_w1"], params["enc_b1"])))
    y = pool2(jax.nn.relu(conv3(y, params["enc_w2"], params["enc_b2"])))
    y = jax.nn.relu(convt2(y, params["dec_w1"], params["dec_b1"]))
    y = jax.nn.sigmoid(convt2(y, params["dec_w2"], params["dec_b2"]))
    return y


if __name__ == "__main__":
    # TODO(synk): torchvision MNIST dataset loading / transforms are a data pipeline, not part
    # of the module forward; deterministic random inputs are used instead.
    B, C, H, W = 2, 1, 16, 16
    key = jax.random.PRNGKey(0)
    k_x, k_p = jax.random.split(key)
    x = jax.random.uniform(k_x, (B, C, H, W), jnp.float32)

    params = init_params(k_p, inchannels=C)
    consts = prepare_constants(params, H, W)     # one-time host-side weight packing

    fwd = jax.jit(autoencoder_forward)
    out = jax.block_until_ready(fwd(consts, x))

    assert out.shape == (B, C, H, W), out.shape
    assert bool(jnp.all(jnp.isfinite(out)))
    assert bool(jnp.all((out >= 0.0) & (out <= 1.0)))        # sigmoid range

    ref = reference_forward(params, x)
    max_err = float(jnp.max(jnp.abs(out - ref)))
    assert max_err < 5e-3, f"max abs error vs reference: {max_err}"

    print("KERNEL_OK")
</pallas_src>

<mosaic_0001>
module attributes {stable_mosaic.version = 11 : i64} {
  func.func @_fused_autoencoder_kernel(%arg0: i32, %arg1: memref<1x16x16xf32, #tpu.memory_space<vmem>>, %arg2: memref<2x16x16xf32, #tpu.memory_space<vmem>>, %arg3: memref<3x16x256xf32, #tpu.memory_space<vmem>>, %arg4: memref<2x8x16xf32, #tpu.memory_space<vmem>>, %arg5: memref<2x256x128xf32, #tpu.memory_space<vmem>>, %arg6: memref<1x128xf32, #tpu.memory_space<vmem>>, %arg7: memref<2x8x8xf32, #tpu.memory_space<vmem>>, %arg8: memref<3x128x32xf32, #tpu.memory_space<vmem>>, %arg9: memref<2x4x8xf32, #tpu.memory_space<vmem>>, %arg10: memref<2x32x16xf32, #tpu.memory_space<vmem>>, %arg11: memref<1x16xf32, #tpu.memory_space<vmem>>, %arg12: memref<2x16x128xf32, #tpu.memory_space<vmem>>, %arg13: memref<1x128xf32, #tpu.memory_space<vmem>>, %arg14: memref<2x128x16xf32, #tpu.memory_space<vmem>>, %arg15: memref<2x2x16x4xf32, #tpu.memory_space<vmem>>, %arg16: memref<1x16xf32, #tpu.memory_space<vmem>>, %arg17: memref<1x16x16xf32, #tpu.memory_space<vmem>>) attributes {dimension_semantics = [#tpu.dimension_semantics<parallel>], iteration_bounds = array<i64: 2>, scalar_prefetch = 0 : i64, scratch_operands = 0 : i64, tpu.core_type = #tpu.core_type<tc>, window_params = [{transform_indices = @transform_0, window_bounds = array<i64: 1, 16, 16>}, {pipeline_mode = #tpu.pipeline_mode<synchronous>, transform_indices = @transform_1, window_bounds = array<i64: 2, 16, 16>}, {pipeline_mode = #tpu.pipeline_mode<synchronous>, transform_indices = @transform_2, window_bounds = array<i64: 3, 16, 256>}, {pipeline_mode = #tpu.pipeline_mode<synchronous>, transform_indices = @transform_3, window_bounds = array<i64: 2, 8, 16>}, {pipeline_mode = #tpu.pipeline_mode<synchronous>, transform_indices = @transform_4, window_bounds = array<i64: 2, 256, 128>}, {pipeline_mode = #tpu.pipeline_mode<synchronous>, transform_indices = @transform_5, window_bounds = array<i64: 1, 128>}, {pipeline_mode = #tpu.pipeline_mode<synchronous>, transform_indices = @transform_6, window_bounds = array<i64: 2, 8, 8>}, {pipeline_mode = #tpu.pipeline_mode<synchronous>, transform_indices = @transform_7, window_bounds = array<i64: 3, 128, 32>}, {pipeline_mode = #tpu.pipeline_mode<synchronous>, transform_indices = @transform_8, window_bounds = array<i64: 2, 4, 8>}, {pipeline_mode = #tpu.pipeline_mode<synchronous>, transform_indices = @transform_9, window_bounds = array<i64: 2, 32, 16>}, {pipeline_mode = #tpu.pipeline_mode<synchronous>, transform_indices = @transform_10, window_bounds = array<i64: 1, 16>}, {pipeline_mode = #tpu.pipeline_mode<synchronous>, transform_indices = @transform_11, window_bounds = array<i64: 2, 16, 128>}, {pipeline_mode = #tpu.pipeline_mode<synchronous>, transform_indices = @transform_12, window_bounds = array<i64: 1, 128>}, {pipeline_mode = #tpu.pipeline_mode<synchronous>, transform_indices = @transform_13, window_bounds = array<i64: 2, 128, 16>}, {pipeline_mode = #tpu.pipeline_mode<synchronous>, transform_indices = @transform_14, window_bounds = array<i64: 2, 2, 16, 4>}, {pipeline_mode = #tpu.pipeline_mode<synchronous>, transform_indices = @transform_15, window_bounds = array<i64: 1, 16>}, {transform_indices = @transform_16, window_bounds = array<i64: 1, 16, 16>}]} {
    %c0 = arith.constant 0 : index
    %c0_0 = arith.constant 0 : index
    %c0_1 = arith.constant 0 : index
    %0 = vector.load %arg1[%c0, %c0_0, %c0_1] : memref<1x16x16xf32, #tpu.memory_space<vmem>>, vector<1x16x16xf32>
    %1 = vector.shape_cast %0 : vector<1x16x16xf32> to vector<16x16xf32>
    %c0_2 = arith.constant 0 : index
    %c0_3 = arith.constant 0 : index
    %c0_4 = arith.constant 0 : index
    %2 = vector.load %arg2[%c0_2, %c0_3, %c0_4] : memref<2x16x16xf32, #tpu.memory_space<vmem>>, vector<1x16x16xf32>
    %3 = vector.shape_cast %2 : vector<1x16x16xf32> to vector<16x16xf32>
    %cst = arith.constant dense<0.000000e+00> : vector<16x16xf32>
    %4 = tpu.matmul %3, %1, %cst {dimension_numbers = #tpu.dot_dimension_numbers<[1], [0], [0], [1], [0, 0, 1, 1], [], []>} : vector<16x16xf32>, vector<16x16xf32>, vector<16x16xf32> -> vector<16x16xf32>
    %c0_5 = arith.constant 0 : index
    %c0_6 = arith.constant 0 : index
    %c0_7 = arith.constant 0 : index
    %5 = vector.load %arg3[%c0_5, %c0_6, %c0_7] : memref<3x16x256xf32, #tpu.memory_space<vmem>>, vector<1x16x256xf32>
    %6 = vector.shape_cast %5 : vector<1x16x256xf32> to vector<16x256xf32>
    %cst_8 = arith.constant dense<0.000000e+00> : vector<16x256xf32>
    %7 = tpu.matmul %4, %6, %cst_8 {dimension_numbers = #tpu.dot_dimension_numbers<[1], [0], [0], [1], [0, 0, 1, 1], [], []>} : vector<16x16xf32>, vector<16x256xf32>, vector<16x256xf32> -> vector<16x256xf32>
    %c1 = arith.constant 1 : index
    %c0_9 = arith.constant 0 : index
    %c0_10 = arith.constant 0 : index
    %8 = vector.load %arg3[%c1, %c0_9, %c0_10] : memref<3x16x256xf32, #tpu.memory_space<vmem>>, vector<1x16x256xf32>
    %9 = vector.shape_cast %8 : vector<1x16x256xf32> to vector<16x256xf32>
    %cst_11 = arith.constant dense<0.000000e+00> : vector<16x256xf32>
    %10 = tpu.matmul %1, %9, %cst_11 {dimension_numbers = #tpu.dot_dimension_numbers<[1], [0], [0], [1], [0, 0, 1, 1], [], []>} : vector<16x16xf32>, vector<16x256xf32>, vector<16x256xf32> -> vector<16x256xf32>
    %11 = arith.addf %7, %10 : vector<16x256xf32>
    %c1_12 = arith.constant 1 : index
    %c0_13 = arith.constant 0 : index
    %c0_14 = arith.constant 0 : index
    %12 = vector.load %arg2[%c1_12, %c0_13, %c0_14] : memref<2x16x16xf32, #tpu.memory_space<vmem>>, vector<1x16x16xf32>
    %13 = vector.shape_cast %12 : vector<1x16x16xf32> to vector<16x16xf32>
    %cst_15 = arith.constant dense<0.000000e+00> : vector<16x16xf32>
    %14 = tpu.matmul %13, %1, %cst_15 {dimension_numbers = #tpu.dot_dimension_numbers<[1], [0], [0], [1], [0, 0, 1, 1], [], []>} : vector<16x16xf32>, vector<16x16xf32>, vector<16x16xf32> -> vector<16x16xf32>
    %c2 = arith.constant 2 : index
    %c0_16 = arith.constant 0 : index
    %c0_17 = arith.constant 0 : index
    %15 = vector.load %arg3[%c2, %c0_16, %c0_17] : memref<3x16x256xf32, #tpu.memory_space<vmem>>, vector<1x16x256xf32>
    %16 = vector.shape_cast %15 : vector<1x16x256xf32> to vector<16x256xf32>
    %cst_18 = arith.constant dense<0.000000e+00> : vector<16x256xf32>
    %17 = tpu.matmul %14, %16, %cst_18 {dimension_numbers = #tpu.dot_dimension_numbers<[1], [0], [0], [1], [0, 0, 1, 1], [], []>} : vector<16x16xf32>, vector<16x256xf32>, vector<16x256xf32> -> vector<16x256xf32>
    %18 = arith.addf %11, %17 : vector<16x256xf32>
    %c0_19 = arith.constant 0 : index
    %c0_20 = arith.constant 0 : index
    %c0_21 = arith.constant 0 : index
    %19 = vector.load %arg4[%c0_19, %c0_20, %c0_21] : memref<2x8x16xf32, #tpu.memory_space<vmem>>, vector<1x8x16xf32>
    %20 = vector.shape_cast %19 : vector<1x8x16xf32> to vector<8x16xf32>
    %cst_22 = arith.constant dense<0.000000e+00> : vector<8x256xf32>
    %21 = tpu.matmul %20, %18, %cst_22 {dimension_numbers = #tpu.dot_dimension_numbers<[1], [0], [0], [1], [0, 0, 1, 1], [], []>} : vector<8x16xf32>, vector<16x256xf32>, vector<8x256xf32> -> vector<8x256xf32>
    %c1_23 = arith.constant 1 : index
    %c0_24 = arith.constant 0 : index
    %c0_25 = arith.constant 0 : index
    %22 = vector.load %arg4[%c1_23, %c0_24, %c0_25] : memref<2x8x16xf32, #tpu.memory_space<vmem>>, vector<1x8x16xf32>
    %23 = vector.shape_cast %22 : vector<1x8x16xf32> to vector<8x16xf32>
    %cst_26 = arith.constant dense<0.000000e+00> : vector<8x256xf32>
    %24 = tpu.matmul %23, %18, %cst_26 {dimension_numbers = #tpu.dot_dimension_numbers<[1], [0], [0], [1], [0, 0, 1, 1], [], []>} : vector<8x16xf32>, vector<16x256xf32>, vector<8x256xf32> -> vector<8x256xf32>
    %25 = arith.maximumf %21, %24 : vector<8x256xf32>
    %c0_27 = arith.constant 0 : index
    %c0_28 = arith.constant 0 : index
    %c0_29 = arith.constant 0 : index
    %26 = vector.load %arg5[%c0_27, %c0_28, %c0_29] : memref<2x256x128xf32, #tpu.memory_space<vmem>>, vector<1x256x128xf32>
    %27 = vector.shape_cast %26 : vector<1x256x128xf32> to vector<256x128xf32>
    %cst_30 = arith.constant dense<0.000000e+00> : vector<8x128xf32>
    %28 = tpu.matmul %25, %27, %cst_30 {dimension_numbers = #tpu.dot_dimension_numbers<[1], [0], [0], [1], [0, 0, 1, 1], [], []>} : vector<8x256xf32>, vector<256x128xf32>, vector<8x128xf32> -> vector<8x128xf32>
    %c1_31 = arith.constant 1 : index
    %c0_32 = arith.constant 0 : index
    %c0_33 = arith.constant 0 : index
    %29 = vector.load %arg5[%c1_31, %c0_32, %c0_33] : memref<2x256x128xf32, #tpu.memory_space<vmem>>, vector<1x256x128xf32>
    %30 = vector.shape_cast %29 : vector<1x256x128xf32> to vector<256x128xf32>
    %cst_34 = arith.constant dense<0.000000e+00> : vector<8x128xf32>
    %31 = tpu.matmul %25, %30, %cst_34 {dimension_numbers = #tpu.dot_dimension_numbers<[1], [0], [0], [1], [0, 0, 1, 1], [], []>} : vector<8x256xf32>, vector<256x128xf32>, vector<8x128xf32> -> vector<8x128xf32>
    %32 = arith.maximumf %28, %31 : vector<8x128xf32>
    %c0_35 = arith.constant 0 : index
    %c0_36 = arith.constant 0 : index
    %33 = vector.load %arg6[%c0_35, %c0_36] : memref<1x128xf32, #tpu.memory_space<vmem>>, vector<1x128xf32>
    %34 = vector.broadcast %33 : vector<1x128xf32> to vector<8x128xf32>
    %35 = arith.addf %32, %34 : vector<8x128xf32>
    %cst_37 = arith.constant 0.000000e+00 : f32
    %36 = vector.broadcast %cst_37 : f32 to vector<8x128xf32>
    %37 = arith.maximumf %35, %36 : vector<8x128xf32>
    %c0_38 = arith.constant 0 : index
    %c0_39 = arith.constant 0 : index
    %c0_40 = arith.constant 0 : index
    %38 = vector.load %arg7[%c0_38, %c0_39, %c0_40] : memref<2x8x8xf32, #tpu.memory_space<vmem>>, vector<1x8x8xf32>
    %39 = vector.shape_cast %38 : vector<1x8x8xf32> to vector<8x8xf32>
    %cst_41 = arith.constant dense<0.000000e+00> : vector<8x128xf32>
    %40 = tpu.matmul %39, %37, %cst_41 {dimension_numbers = #tpu.dot_dimension_numbers<[1], [0], [0], [1], [0, 0, 1, 1], [], []>} : vector<8x8xf32>, vector<8x128xf32>, vector<8x128xf32> -> vector<8x128xf32>
    %c0_42 = arith.constant 0 : index
    %c0_43 = arith.constant 0 : index
    %c0_44 = arith.constant 0 : index
    %41 = vector.load %arg8[%c0_42, %c0_43, %c0_44] : memref<3x128x32xf32, #tpu.memory_space<vmem>>, vector<1x128x32xf32>
    %42 = vector.shape_cast %41 : vector<1x128x32xf32> to vector<128x32xf32>
    %cst_45 = arith.constant dense<0.000000e+00> : vector<8x32xf32>
    %43 = tpu.matmul %40, %42, %cst_45 {dimension_numbers = #tpu.dot_dimension_numbers<[1], [0], [0], [1], [0, 0, 1, 1], [], []>} : vector<8x128xf32>, vector<128x32xf32>, vector<8x32xf32> -> vector<8x32xf32>
    %c1_46 = arith.constant 1 : index
    %c0_47 = arith.constant 0 : index
    %c0_48 = arith.constant 0 : index
    %44 = vector.load %arg8[%c1_46, %c0_47, %c0_48] : memref<3x128x32xf32, #tpu.memory_space<vmem>>, vector<1x128x32xf32>
    %45 = vector.shape_cast %44 : vector<1x128x32xf32> to vector<128x32xf32>
    %cst_49 = arith.constant dense<0.000000e+00> : vector<8x32xf32>
    %46 = tpu.matmul %37, %45, %cst_49 {dimension_numbers = #tpu.dot_dimension_numbers<[1], [0], [0], [1], [0, 0, 1, 1], [], []>} : vector<8x128xf32>, vector<128x32xf32>, vector<8x32xf32> -> vector<8x32xf32>
    %47 = arith.addf %43, %46 : vector<8x32xf32>
    %c1_50 = arith.constant 1 : index
    %c0_51 = arith.constant 0 : index
    %c0_52 = arith.constant 0 : index
    %48 = vector.load %arg7[%c1_50, %c0_51, %c0_52] : memref<2x8x8xf32, #tpu.memory_space<vmem>>, vector<1x8x8xf32>
    %49 = vector.shape_cast %48 : vector<1x8x8xf32> to vector<8x8xf32>
    %cst_53 = arith.constant dense<0.000000e+00> : vector<8x128xf32>
    %50 = tpu.matmul %49, %37, %cst_53 {dimension_numbers = #tpu.dot_dimension_numbers<[1], [0], [0], [1], [0, 0, 1, 1], [], []>} : vector<8x8xf32>, vector<8x128xf32>, vector<8x128xf32> -> vector<8x128xf32>
    %c2_54 = arith.constant 2 : index
    %c0_55 = arith.constant 0 : index
    %c0_56 = arith.constant 0 : index
    %51 = vector.load %arg8[%c2_54, %c0_55, %c0_56] : memref<3x128x32xf32, #tpu.memory_space<vmem>>, vector<1x128x32xf32>
    %52 = vector.shape_cast %51 : vector<1x128x32xf32> to vector<128x32xf32>
    %cst_57 = arith.constant dense<0.000000e+00> : vector<8x32xf32>
    %53 = tpu.matmul %50, %52, %cst_57 {dimension_numbers = #tpu.dot_dimension_numbers<[1], [0], [0], [1], [0, 0, 1, 1], [], []>} : vector<8x128xf32>, vector<128x32xf32>, vector<8x32xf32> -> vector<8x32xf32>
    %54 = arith.addf %47, %53 : vector<8x32xf32>
    %c0_58 = arith.constant 0 : index
    %c0_59 = arith.constant 0 : index
    %c0_60 = arith.constant 0 : index
    %55 = vector.load %arg9[%c0_58, %c0_59, %c0_60] : memref<2x4x8xf32, #tpu.memory_space<vmem>>, vector<1x4x8xf32>
    %56 = vector.shape_cast %55 : vector<1x4x8xf32> to vector<4x8xf32>
    %cst_61 = arith.constant dense<0.000000e+00> : vector<4x32xf32>
    %57 = tpu.matmul %56, %54, %cst_61 {dimension_numbers = #tpu.dot_dimension_numbers<[1], [0], [0], [1], [0, 0, 1, 1], [], []>} : vector<4x8xf32>, vector<8x32xf32>, vector<4x32xf32> -> vector<4x32xf32>
    %c1_62 = arith.constant 1 : index
    %c0_63 = arith.constant 0 : index
    %c0_64 = arith.constant 0 : index
    %58 = vector.load %arg9[%c1_62, %c0_63, %c0_64] : memref<2x4x8xf32, #tpu.memory_space<vmem>>, vector<1x4x8xf32>
    %59 = vector.shape_cast %58 : vector<1x4x8xf32> to vector<4x8xf32>
    %cst_65 = arith.constant dense<0.000000e+00> : vector<4x32xf32>
    %60 = tpu.matmul %59, %54, %cst_65 {dimension_numbers = #tpu.dot_dimension_numbers<[1], [0], [0], [1], [0, 0, 1, 1], [], []>} : vector<4x8xf32>, vector<8x32xf32>, vector<4x32xf32> -> vector<4x32xf32>
    %61 = arith.maximumf %57, %60 : vector<4x32xf32>
    %c0_66 = arith.constant 0 : index
    %c0_67 = arith.constant 0 : index
    %c0_68 = arith.constant 0 : index
    %62 = vector.load %arg10[%c0_66, %c0_67, %c0_68] : memref<2x32x16xf32, #tpu.memory_space<vmem>>, vector<1x32x16xf32>
    %63 = vector.shape_cast %62 : vector<1x32x16xf32> to vector<32x16xf32>
    %cst_69 = arith.constant dense<0.000000e+00> : vector<4x16xf32>
    %64 = tpu.matmul %61, %63, %cst_69 {dimension_numbers = #tpu.dot_dimension_numbers<[1], [0], [0], [1], [0, 0, 1, 1], [], []>} : vector<4x32xf32>, vector<32x16xf32>, vector<4x16xf32> -> vector<4x16xf32>
    %c1_70 = arith.constant 1 : index
    %c0_71 = arith.constant 0 : index
    %c0_72 = arith.constant 0 : index
    %65 = vector.load %arg10[%c1_70, %c0_71, %c0_72] : memref<2x32x16xf32, #tpu.memory_space<vmem>>, vector<1x32x16xf32>
    %66 = vector.shape_cast %65 : vector<1x32x16xf32> to vector<32x16xf32>
    %cst_73 = arith.constant dense<0.000000e+00> : vector<4x16xf32>
    %67 = tpu.matmul %61, %66, %cst_73 {dimension_numbers = #tpu.dot_dimension_numbers<[1], [0], [0], [1], [0, 0, 1, 1], [], []>} : vector<4x32xf32>, vector<32x16xf32>, vector<4x16xf32> -> vector<4x16xf32>
    %68 = arith.maximumf %64, %67 : vector<4x16xf32>
    %c0_74 = arith.constant 0 : index
    %c0_75 = arith.constant 0 : index
    %69 = vector.load %arg11[%c0_74, %c0_75] : memref<1x16xf32, #tpu.memory_space<vmem>>, vector<1x16xf32>
    %70 = vector.broadcast %69 : vector<1x16xf32> to vector<4x16xf32>
    %71 = arith.addf %68, %70 : vector<4x16xf32>
    %cst_76 = arith.constant 0.000000e+00 : f32
    %72 = vector.broadcast %cst_76 : f32 to vector<4x16xf32>
    %73 = arith.maximumf %71, %72 : vector<4x16xf32>
    %c0_77 = arith.constant 0 : index
    %c0_78 = arith.constant 0 : index
    %c0_79 = arith.constant 0 : index
    %74 = vector.load %arg12[%c0_77, %c0_78, %c0_79] : memref<2x16x128xf32, #tpu.memory_space<vmem>>, vector<1x16x128xf32>
    %75 = vector.shape_cast %74 : vector<1x16x128xf32> to vector<16x128xf32>
    %cst_80 = arith.constant dense<0.000000e+00> : vector<4x128xf32>
    %76 = tpu.matmul %73, %75, %cst_80 {dimension_numbers = #tpu.dot_dimension_numbers<[1], [0], [0], [1], [0, 0, 1, 1], [], []>} : vector<4x16xf32>, vector<16x128xf32>, vector<4x128xf32> -> vector<4x128xf32>
    %c0_81 = arith.constant 0 : index
    %c0_82 = arith.constant 0 : index
    %77 = vector.load %arg13[%c0_81, %c0_82] : memref<1x128xf32, #tpu.memory_space<vmem>>, vector<1x128xf32>
    %78 = vector.broadcast %77 : vector<1x128xf32> to vector<4x128xf32>
    %79 = arith.addf %76, %78 : vector<4x128xf32>
    %cst_83 = arith.constant 0.000000e+00 : f32
    %80 = vector.broadcast %cst_83 : f32 to vector<4x128xf32>
    %81 = arith.maximumf %79, %80 : vector<4x128xf32>
    %c1_84 = arith.constant 1 : index
    %c0_85 = arith.constant 0 : index
    %c0_86 = arith.constant 0 : index
    %82 = vector.load %arg12[%c1_84, %c0_85, %c0_86] : memref<2x16x128xf32, #tpu.memory_space<vmem>>, vector<1x16x128xf32>
    %83 = vector.shape_cast %82 : vector<1x16x128xf32> to vector<16x128xf32>
    %cst_87 = arith.constant dense<0.000000e+00> : vector<4x128xf32>
    %84 = tpu.matmul %73, %83, %cst_87 {dimension_numbers = #tpu.dot_dimension_numbers<[1], [0], [0], [1], [0, 0, 1, 1], [], []>} : vector<4x16xf32>, vector<16x128xf32>, vector<4x128xf32> -> vector<4x128xf32>
    %c0_88 = arith.constant 0 : index
    %c0_89 = arith.constant 0 : index
    %85 = vector.load %arg13[%c0_88, %c0_89] : memref<1x128xf32, #tpu.memory_space<vmem>>, vector<1x128xf32>
    %86 = vector.broadcast %85 : vector<1x128xf32> to vector<4x128xf32>
    %87 = arith.addf %84, %86 : vector<4x128xf32>
    %cst_90 = arith.constant 0.000000e+00 : f32
    %88 = vector.broadcast %cst_90 : f32 to vector<4x128xf32>
    %89 = arith.maximumf %87, %88 : vector<4x128xf32>
    %c0_91 = arith.constant 0 : index
    %c0_92 = arith.constant 0 : index
    %c0_93 = arith.constant 0 : index
    %c0_94 = arith.constant 0 : index
    %90 = vector.load %arg15[%c0_91, %c0_92, %c0_93, %c0_94] : memref<2x2x16x4xf32, #tpu.memory_space<vmem>>, vector<1x1x16x4xf32>
    %91 = vector.shape_cast %90 : vector<1x1x16x4xf32> to vector<16x4xf32>
    %c0_95 = arith.constant 0 : index
    %c0_96 = arith.constant 0 : index
    %c0_97 = arith.constant 0 : index
    %92 = vector.load %arg14[%c0_95, %c0_96, %c0_97] : memref<2x128x16xf32, #tpu.memory_space<vmem>>, vector<1x128x16xf32>
    %93 = vector.shape_cast %92 : vector<1x128x16xf32> to vector<128x16xf32>
    %cst_98 = arith.constant dense<0.000000e+00> : vector<4x16xf32>
    %94 = tpu.matmul %81, %93, %cst_98 {dimension_numbers = #tpu.dot_dimension_numbers<[1], [0], [0], [1], [0, 0, 1, 1], [], []>} : vector<4x128xf32>, vector<128x16xf32>, vector<4x16xf32> -> vector<4x16xf32>
    %cst_99 = arith.constant dense<0.000000e+00> : vector<16x16xf32>
    %95 = tpu.matmul %91, %94, %cst_99 {dimension_numbers = #tpu.dot_dimension_numbers<[1], [0], [0], [1], [0, 0, 1, 1], [], []>} : vector<16x4xf32>, vector<4x16xf32>, vector<16x16xf32> -> vector<16x16xf32>
    %c0_100 = arith.constant 0 : index
    %c1_101 = arith.constant 1 : index
    %c0_102 = arith.constant 0 : index
    %c0_103 = arith.constant 0 : index
    %96 = vector.load %arg15[%c0_100, %c1_101, %c0_102, %c0_103] : memref<2x2x16x4xf32, #tpu.memory_space<vmem>>, vector<1x1x16x4xf32>
    %97 = vector.shape_cast %96 : vector<1x1x16x4xf32> to vector<16x4xf32>
    %c1_104 = arith.constant 1 : index
    %c0_105 = arith.constant 0 : index
    %c0_106 = arith.constant 0 : index
    %98 = vector.load %arg14[%c1_104, %c0_105, %c0_106] : memref<2x128x16xf32, #tpu.memory_space<vmem>>, vector<1x128x16xf32>
    %99 = vector.shape_cast %98 : vector<1x128x16xf32> to vector<128x16xf32>
    %cst_107 = arith.constant dense<0.000000e+00> : vector<4x16xf32>
    %100 = tpu.matmul %81, %99, %cst_107 {dimension_numbers = #tpu.dot_dimension_numbers<[1], [0], [0], [1], [0, 0, 1, 1], [], []>} : vector<4x128xf32>, vector<128x16xf32>, vector<4x16xf32> -> vector<4x16xf32>
    %cst_108 = arith.constant dense<0.000000e+00> : vector<16x16xf32>
    %101 = tpu.matmul %97, %100, %cst_108 {dimension_numbers = #tpu.dot_dimension_numbers<[1], [0], [0], [1], [0, 0, 1, 1], [], []>} : vector<16x4xf32>, vector<4x16xf32>, vector<16x16xf32> -> vector<16x16xf32>
    %102 = arith.addf %95, %101 : vector<16x16xf32>
    %c1_109 = arith.constant 1 : index
    %c0_110 = arith.constant 0 : index
    %c0_111 = arith.constant 0 : index
    %c0_112 = arith.constant 0 : index
    %103 = vector.load %arg15[%c1_109, %c0_110, %c0_111, %c0_112] : memref<2x2x16x4xf32, #tpu.memory_space<vmem>>, vector<1x1x16x4xf32>
    %104 = vector.shape_cast %103 : vector<1x1x16x4xf32> to vector<16x4xf32>
    %c0_113 = arith.constant 0 : index
    %c0_114 = arith.constant 0 : index
    %c0_115 = arith.constant 0 : index
    %105 = vector.load %arg14[%c0_113, %c0_114, %c0_115] : memref<2x128x16xf32, #tpu.memory_space<vmem>>, vector<1x128x16xf32>
    %106 = vector.shape_cast %105 : vector<1x128x16xf32> to vector<128x16xf32>
    %cst_116 = arith.constant dense<0.000000e+00> : vector<4x16xf32>
    %107 = tpu.matmul %89, %106, %cst_116 {dimension_numbers = #tpu.dot_dimension_numbers<[1], [0], [0], [1], [0, 0, 1, 1], [], []>} : vector<4x128xf32>, vector<128x16xf32>, vector<4x16xf32> -> vector<4x16xf32>
    %cst_117 = arith.constant dense<0.000000e+00> : vector<16x16xf32>
    %108 = tpu.matmul %104, %107, %cst_117 {dimension_numbers = #tpu.dot_dimension_numbers<[1], [0], [0], [1], [0, 0, 1, 1], [], []>} : vector<16x4xf32>, vector<4x16xf32>, vector<16x16xf32> -> vector<16x16xf32>
    %109 = arith.addf %102, %108 : vector<16x16xf32>
    %c1_118 = arith.constant 1 : index
    %c1_119 = arith.constant 1 : index
    %c0_120 = arith.constant 0 : index
    %c0_121 = arith.constant 0 : index
    %110 = vector.load %arg15[%c1_118, %c1_119, %c0_120, %c0_121] : memref<2x2x16x4xf32, #tpu.memory_space<vmem>>, vector<1x1x16x4xf32>
    %111 = vector.shape_cast %110 : vector<1x1x16x4xf32> to vector<16x4xf32>
    %c1_122 = arith.constant 1 : index
    %c0_123 = arith.constant 0 : index
    %c0_124 = arith.constant 0 : index
    %112 = vector.load %arg14[%c1_122, %c0_123, %c0_124] : memref<2x128x16xf32, #tpu.memory_space<vmem>>, vector<1x128x16xf32>
    %113 = vector.shape_cast %112 : vector<1x128x16xf32> to vector<128x16xf32>
    %cst_125 = arith.constant dense<0.000000e+00> : vector<4x16xf32>
    %114 = tpu.matmul %89, %113, %cst_125 {dimension_numbers = #tpu.dot_dimension_numbers<[1], [0], [0], [1], [0, 0, 1, 1], [], []>} : vector<4x128xf32>, vector<128x16xf32>, vector<4x16xf32> -> vector<4x16xf32>
    %cst_126 = arith.constant dense<0.000000e+00> : vector<16x16xf32>
    %115 = tpu.matmul %111, %114, %cst_126 {dimension_numbers = #tpu.dot_dimension_numbers<[1], [0], [0], [1], [0, 0, 1, 1], [], []>} : vector<16x4xf32>, vector<4x16xf32>, vector<16x16xf32> -> vector<16x16xf32>
    %116 = arith.addf %109, %115 : vector<16x16xf32>
    %c0_127 = arith.constant 0 : index
    %c0_128 = arith.constant 0 : index
    %117 = vector.load %arg16[%c0_127, %c0_128] : memref<1x16xf32, #tpu.memory_space<vmem>>, vector<1x16xf32>
    %118 = vector.broadcast %117 : vector<1x16xf32> to vector<16x16xf32>
    %119 = arith.addf %116, %118 : vector<16x16xf32>
    %cst_129 = arith.constant 0.000000e+00 : f32
    %120 = vector.broadcast %cst_129 : f32 to vector<16x16xf32>
    %121 = arith.subf %120, %119 : vector<16x16xf32>
    %122 = math.exp %121 : vector<16x16xf32>
    %cst_130 = arith.constant 1.000000e+00 : f32
    %123 = vector.broadcast %cst_130 : f32 to vector<16x16xf32>
    %124 = arith.addf %123, %122 : vector<16x16xf32>
    %cst_131 = arith.constant 1.000000e+00 : f32
    %125 = vector.broadcast %cst_131 : f32 to vector<16x16xf32>
    %126 = arith.divf %125, %124 : vector<16x16xf32>
    %c0_132 = arith.constant 0 : index
    %c0_133 = arith.constant 0 : index
    %c0_134 = arith.constant 0 : index
    %127 = vector.load %arg17[%c0_132, %c0_133, %c0_134] : memref<1x16x16xf32, #tpu.memory_space<vmem>>, vector<1x16x16xf32>
    %128 = vector.shape_cast %127 : vector<1x16x16xf32> to vector<16x16xf32>
    %129 = vector.shape_cast %126 : vector<16x16xf32> to vector<1x16x16xf32>
    tpu.vector_store %arg17[%c0_132, %c0_133, %c0_134], %129 {strides = array<i32>} : memref<1x16x16xf32, #tpu.memory_space<vmem>>, vector<1x16x16xf32>,
    return
  }
  func.func @transform_0(%arg0: i32) -> (i32, i32, i32) {
    %c0_i32 = arith.constant 0 : i32
    %c0_i32_0 = arith.constant 0 : i32
    %c0_i32_1 = arith.constant 0 : i32
    return %arg0, %c0_i32, %c0_i32_0 : i32, i32, i32
  }
  func.func @transform_1(%arg0: i32) -> (i32, i32, i32) {
    %c0_i32 = arith.constant 0 : i32
    %c0_i32_0 = arith.constant 0 : i32
    %c0_i32_1 = arith.constant 0 : i32
    %c0_i32_2 = arith.constant 0 : i32
    return %c0_i32, %c0_i32_0, %c0_i32_1 : i32, i32, i32
  }
  func.func @transform_2(%arg0: i32) -> (i32, i32, i32) {
    %c0_i32 = arith.constant 0 : i32
    %c0_i32_0 = arith.constant 0 : i32
    %c0_i32_1 = arith.constant 0 : i32
    %c0_i32_2 = arith.constant 0 : i32
    return %c0_i32, %c0_i32_0, %c0_i32_1 : i32, i32, i32
  }
  func.func @transform_3(%arg0: i32) -> (i32, i32, i32) {
    %c0_i32 = arith.constant 0 : i32
    %c0_i32_0 = arith.constant 0 : i32
    %c0_i32_1 = arith.constant 0 : i32
    %c0_i32_2 = arith.constant 0 : i32
    return %c0_i32, %c0_i32_0, %c0_i32_1 : i32, i32, i32
  }
  func.func @transform_4(%arg0: i32) -> (i32, i32, i32) {
    %c0_i32 = arith.constant 0 : i32
    %c0_i32_0 = arith.constant 0 : i32
    %c0_i32_1 = arith.constant 0 : i32
    %c0_i32_2 = arith.constant 0 : i32
    return %c0_i32, %c0_i32_0, %c0_i32_1 : i32, i32, i32
  }
  func.func @transform_5(%arg0: i32) -> (i32, i32) {
    %c0_i32 = arith.constant 0 : i32
    %c0_i32_0 = arith.constant 0 : i32
    %c0_i32_1 = arith.constant 0 : i32
    return %c0_i32, %c0_i32_0 : i32, i32
  }
  func.func @transform_6(%arg0: i32) -> (i32, i32, i32) {
    %c0_i32 = arith.constant 0 : i32
    %c0_i32_0 = arith.constant 0 : i32
    %c0_i32_1 = arith.constant 0 : i32
    %c0_i32_2 = arith.constant 0 : i32
    return %c0_i32, %c0_i32_0, %c0_i32_1 : i32, i32, i32
  }
  func.func @transform_7(%arg0: i32) -> (i32, i32, i32) {
    %c0_i32 = arith.constant 0 : i32
    %c0_i32_0 = arith.constant 0 : i32
    %c0_i32_1 = arith.constant 0 : i32
    %c0_i32_2 = arith.constant 0 : i32
    return %c0_i32, %c0_i32_0, %c0_i32_1 : i32, i32, i32
  }
  func.func @transform_8(%arg0: i32) -> (i32, i32, i32) {
    %c0_i32 = arith.constant 0 : i32
    %c0_i32_0 = arith.constant 0 : i32
    %c0_i32_1 = arith.constant 0 : i32
    %c0_i32_2 = arith.constant 0 : i32
    return %c0_i32, %c0_i32_0, %c0_i32_1 : i32, i32, i32
  }
  func.func @transform_9(%arg0: i32) -> (i32, i32, i32) {
    %c0_i32 = arith.constant 0 : i32
    %c0_i32_0 = arith.constant 0 : i32
    %c0_i32_1 = arith.constant 0 : i32
    %c0_i32_2 = arith.constant 0 : i32
    return %c0_i32, %c0_i32_0, %c0_i32_1 : i32, i32, i32
  }
  func.func @transform_10(%arg0: i32) -> (i32, i32) {
    %c0_i32 = arith.constant 0 : i32
    %c0_i32_0 = arith.constant 0 : i32
    %c0_i32_1 = arith.constant 0 : i32
    return %c0_i32, %c0_i32_0 : i32, i32
  }
  func.func @transform_11(%arg0: i32) -> (i32, i32, i32) {
    %c0_i32 = arith.constant 0 : i32
    %c0_i32_0 = arith.constant 0 : i32
    %c0_i32_1 = arith.constant 0 : i32
    %c0_i32_2 = arith.constant 0 : i32
    return %c0_i32, %c0_i32_0, %c0_i32_1 : i32, i32, i32
  }
  func.func @transform_12(%arg0: i32) -> (i32, i32) {
    %c0_i32 = arith.constant 0 : i32
    %c0_i32_0 = arith.constant 0 : i32
    %c0_i32_1 = arith.constant 0 : i32
    return %c0_i32, %c0_i32_0 : i32, i32
  }
  func.func @transform_13(%arg0: i32) -> (i32, i32, i32) {
    %c0_i32 = arith.constant 0 : i32
    %c0_i32_0 = arith.constant 0 : i32
    %c0_i32_1 = arith.constant 0 : i32
    %c0_i32_2 = arith.constant 0 : i32
    return %c0_i32, %c0_i32_0, %c0_i32_1 : i32, i32, i32
  }
  func.func @transform_14(%arg0: i32) -> (i32, i32, i32, i32) {
    %c0_i32 = arith.constant 0 : i32
    %c0_i32_0 = arith.constant 0 : i32
    %c0_i32_1 = arith.constant 0 : i32
    %c0_i32_2 = arith.constant 0 : i32
    %c0_i32_3 = arith.constant 0 : i32
    return %c0_i32, %c0_i32_0, %c0_i32_1, %c0_i32_2 : i32, i32, i32, i32
  }
  func.func @transform_15(%arg0: i32) -> (i32, i32) {
    %c0_i32 = arith.constant 0 : i32
    %c0_i32_0 = arith.constant 0 : i32
    %c0_i32_1 = arith.constant 0 : i32
    return %c0_i32, %c0_i32_0 : i32, i32
  }
  func.func @transform_16(%arg0: i32) -> (i32, i32, i32) {
    %c0_i32 = arith.constant 0 : i32
    %c0_i32_0 = arith.constant 0 : i32
    %c0_i32_1 = arith.constant 0 : i32
    return %arg0, %c0_i32, %c0_i32_0 : i32, i32, i32
  }
}

</mosaic_0001>

<bundles_post_ra>
// kernel: autoencoder_forward.1
= control target key start
LH: loop header
LB: loop body
LE: loop exit
PB: predicated region body
PF: predicated region fallthrough
CT: control target
= control target key end

     0   :  { %s4916_s0 = inlined_call_operand.vmem [shape: f32[2,16,16], index: 0, kind: input, shape index: {}]   ;;  %s4917_s1 = inlined_call_operand.vmem [shape: f32[2,16,16], index: 1, kind: input, shape index: {}]   ;;  %s4918_s2 = inlined_call_operand.vmem [shape: f32[3,16,256], index: 2, kind: input, shape index: {}]   ;;  %s4919_s3 = inlined_call_operand.vmem [shape: f32[2,8,16], index: 3, kind: input, shape index: {}]   ;;  %s4920_s4 = inlined_call_operand.vmem [shape: f32[2,256,128], index: 4, kind: input, shape index: {}]   ;;  %s4921_s5 = inlined_call_operand.vmem [shape: f32[1,128], index: 5, kind: input, shape index: {}]   ;;  %s4922_s6 = inlined_call_operand.vmem [shape: f32[2,8,8], index: 6, kind: input, shape index: {}]   ;;  %s4923_s7 = inlined_call_operand.vmem [shape: f32[3,128,32], index: 7, kind: input, shape index: {}]   ;;  %s4924_s8 = inlined_call_operand.vmem [shape: f32[2,4,8], index: 8, kind: input, shape index: {}]   ;;  %s4925_s9 = inlined_call_operand.vmem [shape: f32[2,32,16], index: 9, kind: input, shape index: {}]   ;;  %s4926_s10 = inlined_call_operand.vmem [shape: f32[1,16], index: 10, kind: input, shape index: {}]   ;;  %s4927_s11 = inlined_call_operand.vmem [shape: f32[2,16,128], index: 11, kind: input, shape index: {}]   ;;  %s4928_s12 = inlined_call_operand.vmem [shape: f32[1,128], index: 12, kind: input, shape index: {}]   ;;  %s4929_s13 = inlined_call_operand.vmem [shape: f32[2,128,16], index: 13, kind: input, shape index: {}]   ;;  %s4930_s14 = inlined_call_operand.vmem [shape: f32[2,2,16,4], index: 14, kind: input, shape index: {}]   ;;  %s4931_s15 = inlined_call_operand.vmem [shape: f32[1,16], index: 15, kind: input, shape index: {}]   ;;  %s4932_s16 = inlined_call_operand.hbm [shape: f32[2,16,16], index: 16, kind: output, shape index: {}]  }
   0x1   :  { %4937 = sst [smem:[#allocation9_spill]] %s4916_s0 }
   0x2   :  { %4938 = sst [smem:[#allocation10_spill]] %s4917_s1 }
   0x3   :  { %21 = vsyncpa [#allocation3], 0 }
   0x4   :  { %23 = vsyncpa [#allocation3 + $0x1], 0  ;;  %s3897_s21 = smov 0   ;;  %s3899_s22 = smov 0  }
   0x5   :  { %s3901_s23 = smov 0   ;;  %s3903_s24 = smov 0  }
   0x6 LB: > { %4939 = sst [smem:[#allocation5_spill]] %s3801_s23  ;;  %s3918_s25 = sadd.s32 4294967295, %s3805_s24   ;;  %s3805_s24 = sphi %s3903_s24, %s4948_s24   ;;  %s3801_s23 = sphi %s3901_s23, %s4953_s23   ;;  %s3797_s22 = sphi %s3899_s22, %s4952_s22   ;;  %s3793_s21 = sphi %s3897_s21, %s4951_s21  }
   0x7   : > { %s2971_s26 = sadd.s32 4294967294, %s3805_s24   ;;  %s3922_s27 = sadd.s32 1, %s3805_s24  }
   0x8   : > { %4940 = sst [smem:[#allocation6_spill]] %s3922_s27  ;;  %s377_s28 = sadd.s32 1, %s3801_s23 }
   0x9   : > { %s374_s29 = ssub.s32 %s3805_s24, %s3922_s27  ;;  %p387_p0 = scmp.ne.s32.totalorder %s3801_s23, %s3797_s22 }
   0xa   : > { %p375_p1 = scmp.eq.s32.totalorder %s374_s29, 0  ;;  %p388_p2 = scmp.eq.s32.totalorder %s3918_s25, 1 }
   0xb   : > { %p393_p3 = scmp.ne.s32.totalorder %s3797_s22, %s3793_s21  ;;  %p394_p4 = scmp.eq.s32.totalorder %s2971_s26, 1 }
   0xc   : > { %s3933_s30 = scalar_select %p375_p1, %s3801_s23, %s377_s28  }
   0xd   : > { %p3935_p5 = por %p388_p2, %p387_p0  ;;  %p3939_p6 = por %p394_p4, %p393_p3 }
   0xe   : > { %4941 = sst [smem:[#allocation7_spill]] %s3933_s30  ;;  %p2974_p7 = scmp.ge.s32.totalorder %s3805_s24, 1 }
   0xf   : > { %s4943_s17 = scalar_select %p3939_p6, 1, 0 }
  0x10   : > { %p465_p8 = scmp.lt.s32.totalorder %s3805_s24, 3 }
  0x11   : > { %4944 = sst [smem:[#allocation8_spill]] %s4943_s17 }
  0x12   : > { %p466_p9 = pnand %p2974_p7, %p465_p8 }
  0x13   : > { %p515_p10 = scmp.lt.s32.totalorder (!%p466_p9), %s3918_s25, 1  ;;  %s4945_s1 = sld [smem:[#allocation10_spill]] (!%p466_p9) }
  0x14   : > { %469 = sbr.rel (%p466_p9) target bundleno = 2773 (0xad5), region = 84  ;;  %s4946_s27 = sld [smem:[#allocation9_spill]] (!%p466_p9) }
  0x15   : > { %s512_s23 = sand.u32 (!%p466_p9), 1, %s3797_s22   ;;  %s3125_s18 = sshll.u32 (!%p466_p9), %s3918_s25, 8 }
  0x16   : > { %s2975_s30 = sshll.u32 (!%p466_p9), %s512_s23, 4  ;;  %s4876_s28 = scalar_lea.sflag (!%p466_p9), [#allocation3], %s512_s23 }
  0x17   : > { %s514_s19 = scalar_lea.vmem (!%p466_p9), [#allocation2], %s2975_s30  ;;  %s3809_s29 = smov (!%p466_p9), [#allocation2]  }
  0x18   : > { %s3749_s30 = sshll.u32 (!%p466_p9), %s3809_s29, 4  ;;  %s3750_s30 = int_to_ptr.vmem [resolvable:$false] %s3749_s30 }
  0x19   : > { %v2983_v0 = vld [vmem:[%s4918_s2 + $0x38] sm:$0xff]  ;;  %v2982_v1 = vld [vmem:[%s4918_s2 + $0x30] sm:$0xff]  ;;  %v2981_v2 = vld [vmem:[%s4918_s2 + $0x28] sm:$0xff]  ;;  %vm524_vm0 = vcmask 130048   ;;  %v3807_v4 = vmov 0.0   ;;  %s516_s20 = scalar_select %p515_p10, %s3918_s25, 1 }
  0x1a   : > { %649 = vmatprep.subr.mxu1 %v2983_v0  ;;  %v2980_v3 = vld [vmem:[%s4918_s2 + $0x20] sm:$0xff]  ;;  %685 = vmatprep.mubr.f32.mxu1 %v3807_v4  ;;  %v523_v8 = vld [vmem:[%s4945_s1 + $0x8] sm:$0xff]  ;;  %v2988_v9 = vld [vmem:[%s4945_s1 + $0x10] sm:$0xff]  ;;  %vm3808_vm1 = vmmov 0   ;;  %vm1326_vm2 = vcmask 64512   ;;  %vm1890_vm3 = vcmask 261120  }
  0x1b   : > { %v522_v5 = vld [vmem:[%s4945_s1] sm:$0xff]  ;;  %650 = vmatpush1.msra.mxu1 %v2982_v1  ;;  %s3124_s26 = sshll.u32 %s516_s20, 4  ;;  %v2989_v10 = vld [vmem:[%s4945_s1 + $0x18] sm:$0xff]  ;;  %v608_v12 = vld [vmem:[%s4918_s2 + $0x10] sm:$0xff]  ;;  %vm2384_vm4 = vcmask 31744   ;;  %vm2391_vm5 = vcmask 1043456  }
  0x1c   : > { %3363 = vmatprep.mubr.msk.f32.mxu0 %vm524_vm0, %v522_v5  ;;  %651 = vmatprep.subr.mxu1 %v2981_v2  ;;  %s519_s17 = scalar_lea.vmem %s4946_s27, %s3124_s26  ;;  %v609_v11 = vld [vmem:[%s4918_s2 + $0x18] sm:$0xff]  ;;  %v607_v13 = vld [vmem:[%s4918_s2 + $0x8] sm:$0xff]  ;;  %v606_v14 = vld [vmem:[%s4918_s2] sm:$0xff]  ;;  %s2909_s27 = sshll.u32 %s514_s19, 4  ;;  %s4872_s27 = int_to_ptr.vmem [resolvable:$true] %s2909_s27 }
  0x1d   : > { %652 = vmatpush1.msra.mxu1 %v2980_v3  ;;  %v521_v6 = vld [vmem:[%s519_s17 + $0x8] sm:$0xff]  ;;  %v520_v7 = vld [vmem:[%s519_s17] sm:$0xff]  ;;  %v2995_v15 = vld [vmem:[%s4918_s2 + $0x58] sm:$0xff]  ;;  %s4870_s26 = scalar_lea.hbm %s4932_s16, %s3125_s18  ;;  %s3745_s25 = scalar_lea.vmem %s4872_s27, 256 }
  0x1e   : > { %3359 = vmatprep.subr.mxu0 %v521_v6  ;;  %2984 = vmatmul.mubr.msk.f32.vlgmr.msra.gmra.mxu1 %vm524_vm0, %v520_v7  ;;  %v2994_v20 = vld [vmem:[%s4918_s2 + $0x50] sm:$0xff]  ;;  %v2993_v23 = vld [vmem:[%s4918_s2 + $0x48] sm:$0xff]  ;;  %v2992_v24 = vld [vmem:[%s4918_s2 + $0x40] sm:$0xff]  ;;  %p3746_p11 = scmp.ne.s32.totalorder %s4872_s27, %s3745_s25  ;;  %s3751_s18 = scalar_lea.vmem %s3750_s30, 512 }
  0x1f   : > { %3360 = vmatpush3.msra.mxu0 %v521_v6  ;;  %691 = vmatprep.mubr.f32.mxu1 %v3807_v4  ;;  %v1141_v27 = vld [vmem:[%s4920_s4 + $0xf8] sm:$0xff]  ;;  %v1140_v29 = vld [vmem:[%s4920_s4 + $0xf0] sm:$0xff]  ;;  %v1139_v31 = vld [vmem:[%s4920_s4 + $0xe8] sm:$0xff]  ;;  %p3752_p0 = scmp.lt.s32.totalorder %s4872_s27, %s3750_s30  ;;  %p3753_p1 = scmp.lt.s32.totalorder %s3751_s18, %s3745_s25 }
  0x20   : > { %3361 = vmatprep.subr.mxu0 %v520_v7  ;;  %3366 = vmatprep.subr.mxu1 %v521_v6  ;;  %v1125_v28 = vld [vmem:[%s4920_s4 + $0x78] sm:$0xff]  ;;  %v1124_v30 = vld [vmem:[%s4920_s4 + $0x70] sm:$0xff]  ;;  %v1123_v32 = vld [vmem:[%s4920_s4 + $0x68] sm:$0xff]  ;;  %p3747_p12 = pnand %p3746_p11, %p3935_p5 }
  0x21   : > { %3362 = vmatpush3.msra.mxu0 %v520_v7  ;;  %3367 = vmatpush3.msra.mxu1 %v521_v6  ;;  %v1138_v33 = vld [vmem:[%s4920_s4 + $0xe0] sm:$0xff]  ;;  %v1137_v35 = vld [vmem:[%s4920_s4 + $0xd8] sm:$0xff]  ;;  %v1136_v37 = vld [vmem:[%s4920_s4 + $0xd0] sm:$0xff]  ;;  %p3754_p2 = por %p3753_p1, %p3752_p0 }
  0x22   : > { %3364 = vmatmul.mubr.msk.f32.vlgmr.msra.gmra.mxu0 %vm524_vm0, %v523_v8  ;;  %2985 = vmatmul.mubr.msk.f32.gmra.mxu1 %vm524_vm0, %v521_v6  ;;  %v1122_v34 = vld [vmem:[%s4920_s4 + $0x60] sm:$0xff]  ;;  %v1121_v36 = vld [vmem:[%s4920_s4 + $0x58] sm:$0xff]  ;;  %v1120_v38 = vld [vmem:[%s4920_s4 + $0x50] sm:$0xff]  ;;  %p3748_p13 = pneg %p3747_p12 }
  0x23   : > { %3368 = vmatprep.subr.mxu1 %v520_v7  ;;  %3370 = vmatprep.mubr.msk.f32.mxu1 %vm524_vm0, %v2988_v9  ;;  %v1135_v39 = vld [vmem:[%s4920_s4 + $0xc8] sm:$0xff]  ;;  %v1134_v41 = vld [vmem:[%s4920_s4 + $0xc0] sm:$0xff]  ;;  %v1133_v43 = vld [vmem:[%s4920_s4 + $0xb8] sm:$0xff] }
  0x24   : > { %3369 = vmatpush3.msra.mxu1 %v520_v7  ;;  %768 = vmatprep.mubr.f32.mxu0 %v3807_v4  ;;  %v1119_v40 = vld [vmem:[%s4920_s4 + $0x48] sm:$0xff]  ;;  %v1118_v42 = vld [vmem:[%s4920_s4 + $0x40] sm:$0xff]  ;;  %v1117_v44 = vld [vmem:[%s4920_s4 + $0x38] sm:$0xff]  ;;  %p3755_p3 = pnand %p3754_p2, %p3748_p13 }
  0x25   : > { %732 = vmatprep.subr.mxu0 %v609_v11  ;;  %v1132_v45 = vld [vmem:[%s4920_s4 + $0xb0] sm:$0xff]  ;;  %v1131_v47 = vld [vmem:[%s4920_s4 + $0xa8] sm:$0xff]  ;;  %v957_v1 = vld [vmem:[%s4919_s3] sm:$0xff] }
  0x26   : > { %3371 = vmatmul.mubr.msk.f32.vlgmr.msra.gmra.mxu1 %vm524_vm0, %v2989_v10  ;;  %733 = vmatpush1.msra.mxu0 %v608_v12  ;;  %v1116_v46 = vld [vmem:[%s4920_s4 + $0x30] sm:$0xff]  ;;  %v1115_v48 = vld [vmem:[%s4920_s4 + $0x28] sm:$0xff]  ;;  %v3032_v3 = vld [vmem:[%s4920_s4 + $0x1f8] sm:$0xff] }
  0x27   : > { %1025 = vmatprep.mubr.f32.mxu1 %v3807_v4  ;;  %734 = vmatprep.subr.mxu0 %v607_v13  ;;  %v2999_v2 = vld [vmem:[%s4919_s3 + $0x8] sm:$0xff]  ;;  %v3016_v5 = vld [vmem:[%s4920_s4 + $0x178] sm:$0xff]  ;;  %v3031_v6 = vld [vmem:[%s4920_s4 + $0x1f0] sm:$0xff] }
  0x28   : > { %735 = vmatpush1.msra.mxu0 %v606_v14  ;;  %v3015_v7 = vld [vmem:[%s4920_s4 + $0x170] sm:$0xff]  ;;  %v3030_v8 = vld [vmem:[%s4920_s4 + $0x1e8] sm:$0xff]  ;;  %v3029_v10 = vld [vmem:[%s4920_s4 + $0x1e0] sm:$0xff] }
  0x29   : > { %904 = vmatprep.subr.mxu0 %v2995_v15  ;;  %v3014_v9 = vld [vmem:[%s4920_s4 + $0x168] sm:$0xff]  ;;  %v3013_v11 = vld [vmem:[%s4920_s4 + $0x160] sm:$0xff]  ;;  %v3028_v12 = vld [vmem:[%s4920_s4 + $0x1d8] sm:$0xff] }
  0x2a   : > { %v3012_v13 = vld [vmem:[%s4920_s4 + $0x158] sm:$0xff]  ;;  %v3027_v14 = vld [vmem:[%s4920_s4 + $0x1d0] sm:$0xff] }
  0x2b   : > { %v3011_v15 = vld [vmem:[%s4920_s4 + $0x150] sm:$0xff] }
  0xde   : > { %v3999_v16 = vpop.f32.mrf.mxu1 }
  0xe0   : > { %v4001_v17 = vpop.f32.mrf.mxu1 }
  0xe2   : > { %v3365_v18 = vpop.f32.mrf.mxu0  ;;  %v4003_v19 = vpop.f32.mrf.mxu1 }
  0xe4   : > { %v597_v21 = vpop.f32.mrf.mxu0  ;;  %v4008_v22 = vpop.f32.mrf.mxu1 }
  0xe5   : > { %2986 = vmatmul.mubr.msk.f32.vlgmr.msra.gmra.mxu0 %vm524_vm0, %v597_v21  ;;  %v3008_v21 = vld [vmem:[%s4920_s4 + $0x138] sm:$0xff] }
  0xe6   : > { %774 = vmatprep.mubr.f32.mxu0 %v3807_v4  ;;  %905 = vmatpush1.msra.mxu0 %v2994_v20  ;;  %v3372_v25 = vpop.f32.mrf.mxu1  ;;  %v3024_v20 = vld [vmem:[%s4920_s4 + $0x1b8] sm:$0xff] }
  0xe7   : > { %906 = vmatprep.subr.mxu0 %v2993_v23  ;;  %v3007_v23 = vld [vmem:[%s4920_s4 + $0x130] sm:$0xff] }
  0xe8   : > { %907 = vmatpush1.msra.mxu0 %v2992_v24  ;;  %v856_v26 = vpop.f32.mrf.mxu1  ;;  %v3022_v24 = vld [vmem:[%s4920_s4 + $0x1a8] sm:$0xff] }
  0xe9   : > { %2987 = vmatmul.mubr.msk.f32.gmra.mxu0 %vm524_vm0, %v3365_v18  ;;  %3134 = vmatprep.subr.mxu0 %v1141_v27  ;;  %v3025_v18 = vld [vmem:[%s4920_s4 + $0x1c0] sm:$0xff] }
  0xea   : > { %940 = vmatprep.mubr.f32.mxu0 %v3807_v4  ;;  %v3021_v27 = vld [vmem:[%s4920_s4 + $0x1a0] sm:$0xff] }
  0xed   : > { %2996 = vmatmul.mubr.msk.f32.vlgmr.msra.gmra.mxu0 %vm524_vm0, %v856_v26  ;;  %v1130_v26 = vld [vmem:[%s4920_s4 + $0xa0] sm:$0xff] }
  0xee   : > { %946 = vmatprep.mubr.f32.mxu0 %v3807_v4  ;;  %3135 = vmatpush3.msra.mxu0 %v1125_v28  ;;  %v1114_v28 = vld [vmem:[%s4920_s4 + $0x20] sm:$0xff] }
  0xef   : > { %3136 = vmatprep.subr.mxu0 %v1140_v29  ;;  %v3005_v29 = vld [vmem:[%s4920_s4 + $0x120] sm:$0xff] }
  0xf0   : > { %3137 = vmatpush3.msra.mxu0 %v1124_v30  ;;  %v1129_v30 = vld [vmem:[%s4920_s4 + $0x98] sm:$0xff] }
  0xf1   : > { %2997 = vmatmul.mubr.msk.f32.gmra.mxu0 %vm524_vm0, %v3372_v25  ;;  %3138 = vmatprep.subr.mxu0 %v1139_v31  ;;  %v3006_v25 = vld [vmem:[%s4920_s4 + $0x128] sm:$0xff]  ;;  %v3020_v31 = vld [vmem:[%s4920_s4 + $0x198] sm:$0xff] }
  0xf2   : > { %3139 = vmatpush3.msra.mxu0 %v1123_v32  ;;  %v1113_v32 = vld [vmem:[%s4920_s4 + $0x18] sm:$0xff] }
  0xf3   : > { %3140 = vmatprep.subr.mxu0 %v1138_v33  ;;  %v3004_v33 = vld [vmem:[%s4920_s4 + $0x118] sm:$0xff] }
  0xf4   : > { %3141 = vmatpush3.msra.mxu0 %v1122_v34  ;;  %v1128_v34 = vld [vmem:[%s4920_s4 + $0x90] sm:$0xff] }
  0xf5   : > { %3142 = vmatprep.subr.mxu0 %v1137_v35  ;;  %v3019_v35 = vld [vmem:[%s4920_s4 + $0x190] sm:$0xff] }
  0xf6   : > { %3143 = vmatpush3.msra.mxu0 %v1121_v36  ;;  %v1112_v36 = vld [vmem:[%s4920_s4 + $0x10] sm:$0xff] }
  0xf7   : > { %3144 = vmatprep.subr.mxu0 %v1136_v37  ;;  %v3003_v37 = vld [vmem:[%s4920_s4 + $0x110] sm:$0xff] }
  0xf8   : > { %3145 = vmatpush3.msra.mxu0 %v1120_v38  ;;  %v1127_v38 = vld [vmem:[%s4920_s4 + $0x88] sm:$0xff] }
  0xf9   : > { %3146 = vmatprep.subr.mxu0 %v1135_v39  ;;  %v3018_v39 = vld [vmem:[%s4920_s4 + $0x188] sm:$0xff] }
  0xfa   : > { %3147 = vmatpush3.msra.mxu0 %v1119_v40  ;;  %v1111_v40 = vld [vmem:[%s4920_s4 + $0x8] sm:$0xff] }
  0xfb   : > { %3148 = vmatprep.subr.mxu0 %v1134_v41  ;;  %v3002_v41 = vld [vmem:[%s4920_s4 + $0x108] sm:$0xff] }
  0xfc   : > { %3149 = vmatpush3.msra.mxu0 %v1118_v42  ;;  %v1126_v42 = vld [vmem:[%s4920_s4 + $0x80] sm:$0xff] }
  0xfd   : > { %3150 = vmatprep.subr.mxu0 %v1133_v43  ;;  %v3017_v43 = vld [vmem:[%s4920_s4 + $0x180] sm:$0xff] }
  0xfe   : > { %3151 = vmatpush3.msra.mxu0 %v1117_v44  ;;  %v1110_v44 = vld [vmem:[%s4920_s4] sm:$0xff] }
  0xff   : > { %3152 = vmatprep.subr.mxu0 %v1132_v45  ;;  %v3001_v45 = vld [vmem:[%s4920_s4 + $0x100] sm:$0xff] }
 0x100   : > { %3153 = vmatpush3.msra.mxu0 %v1116_v46 }
 0x101   : > { %3154 = vmatprep.subr.mxu0 %v1131_v47 }
 0x102   : > { %3155 = vmatpush3.msra.mxu0 %v1115_v48 }
 0x103   : > { %3156 = vmatprep.subr.mxu0 %v1130_v26  ;;  %v3039_v26 = vld [vmem:[%s4923_s7 + $0xa0] sm:$0xff] }
 0x104   : > { %3157 = vmatpush3.msra.mxu0 %v1114_v28  ;;  %v3037_v28 = vld [vmem:[%s4923_s7 + $0x90] sm:$0xff] }
 0x105   : > { %3158 = vmatprep.subr.mxu0 %v1129_v30  ;;  %v3035_v30 = vld [vmem:[%s4923_s7 + $0x80] sm:$0xff] }
 0x106   : > { %3159 = vmatpush3.msra.mxu0 %v1113_v32  ;;  %v1400_v32 = vld [vmem:[%s4923_s7] sm:$0xff] }
 0x107   : > { %3160 = vmatprep.subr.mxu0 %v1128_v34 }
 0x108   : > { %3161 = vmatpush3.msra.mxu0 %v1112_v36 }
 0x109   : > { %3162 = vmatprep.subr.mxu0 %v1127_v38  ;;  %v3065_v38 = vld [vmem:[%s4923_s7 + $0x160] sm:$0xff] }
 0x10a   : > { %3163 = vmatpush3.msra.mxu0 %v1111_v40  ;;  %v3063_v40 = vld [vmem:[%s4923_s7 + $0x150] sm:$0xff] }
 0x10b   : > { %3164 = vmatprep.subr.mxu0 %v1126_v42  ;;  %v3061_v42 = vld [vmem:[%s4923_s7 + $0x140] sm:$0xff] }
 0x10c   : > { %3165 = vmatpush3.msra.mxu0 %v1110_v44  ;;  %v3059_v44 = vld [vmem:[%s4923_s7 + $0x130] sm:$0xff] }
 0x10d   : > { %3373 = vmatprep.subr.mxu0 %v3807_v4 }
 0x1a5   : > { %v770_v49 = vpop.f32.mrf.mxu0 }
 0x1a6   : > { %v771_v61 = vadd.f32 %v770_v49, %v3999_v16  ;;  %v3026_v16 = vld [vmem:[%s4920_s4 + $0x1c8] sm:$0xff] }
 0x1a7   : > { %v772_v50 = vpop.f32.mrf.mxu0 }
 0x1a8   : > { %v773_v59 = vadd.f32 %v772_v50, %v4001_v17  ;;  %v3010_v17 = vld [vmem:[%s4920_s4 + $0x148] sm:$0xff] }
 0x1a9   : > { %v776_v51 = vpop.f32.mrf.mxu0 }
 0x1aa   : > { %v777_v57 = vadd.f32 %v776_v51, %v4003_v19  ;;  %v3009_v19 = vld [vmem:[%s4920_s4 + $0x140] sm:$0xff] }
 0x1ab   : > { %v778_v52 = vpop.f32.mrf.mxu0 }
 0x1ac   : > { %v779_v56 = vadd.f32 %v778_v52, %v4008_v22  ;;  %v3023_v22 = vld [vmem:[%s4920_s4 + $0x1b0] sm:$0xff]  ;;  %v1415_v52 = vld [vmem:[%s4923_s7 + $0x78] sm:$0xff] }
 0x1ad   : > { %v942_v53 = vpop.f32.mrf.mxu0 }
 0x1ae   : > { %v953_v0 = vadd.f32 %v942_v53, %v771_v61  ;;  %v1414_v53 = vld [vmem:[%s4923_s7 + $0x70] sm:$0xff] }
 0x1af   : > { %v944_v54 = vpop.f32.mrf.mxu0  ;;  %v1406_v61 = vld [vmem:[%s4923_s7 + $0x30] sm:$0xff] }
 0x1b0   : > { %v954_v63 = vadd.f32 %v944_v54, %v773_v59  ;;  %v1413_v54 = vld [vmem:[%s4923_s7 + $0x68] sm:$0xff]  ;;  %v1408_v59 = vld [vmem:[%s4923_s7 + $0x40] sm:$0xff] }
 0x1b1   : > { %v948_v55 = vpop.f32.mrf.mxu0 }
 0x1b2   : > { %v955_v62 = vadd.f32 %v948_v55, %v777_v57  ;;  %v1412_v55 = vld [vmem:[%s4923_s7 + $0x60] sm:$0xff]  ;;  %v1410_v57 = vld [vmem:[%s4923_s7 + $0x50] sm:$0xff] }
 0x1b3   : > { %v950_v58 = vpop.f32.mrf.mxu0 }
 0x1b4   : > { %v956_v60 = vadd.f32 %v950_v58, %v779_v56  ;;  %v1411_v56 = vld [vmem:[%s4923_s7 + $0x58] sm:$0xff]  ;;  %v1409_v58 = vld [vmem:[%s4923_s7 + $0x48] sm:$0xff] }
 0x1b6   : > { %989 = vmatprep.subr.mxu1 %v956_v60 }
 0x1b7   : > { %990 = vmatpush1.msra.mxu1 %v955_v62 }
 0x1b8   : > { %991 = vmatprep.subr.mxu1 %v954_v63 }
 0x1b9   : > { %992 = vmatpush1.msra.mxu1 %v953_v0 }
 0x1ba   : > { %2998 = vmatmul.mubr.msk.f32.vlgmr.msra.gmra.mxu1 %vm524_vm0, %v957_v1  ;;  %1065 = vmatprep.subr.mxu1 %v956_v60  ;;  %v1407_v60 = vld [vmem:[%s4923_s7 + $0x38] sm:$0xff]  ;;  %v1402_v1 = vld [vmem:[%s4923_s7 + $0x10] sm:$0xff] }
 0x1bb   : > { %1066 = vmatpush1.msra.mxu1 %v955_v62  ;;  %1101 = vmatprep.mubr.f32.mxu1 %v3807_v4  ;;  %v1405_v62 = vld [vmem:[%s4923_s7 + $0x28] sm:$0xff] }
 0x1bc   : > { %1067 = vmatprep.subr.mxu1 %v954_v63  ;;  %v1404_v63 = vld [vmem:[%s4923_s7 + $0x20] sm:$0xff] }
 0x1bd   : > { %1068 = vmatpush1.msra.mxu1 %v953_v0  ;;  %v1403_v0 = vld [vmem:[%s4923_s7 + $0x18] sm:$0xff] }
 0x1be   : > { %3000 = vmatmul.mubr.msk.f32.vlgmr.msra.gmra.mxu1 %vm524_vm0, %v2999_v2  ;;  %3169 = vmatprep.subr.mxu1 %v3032_v3  ;;  %v1401_v2 = vld [vmem:[%s4923_s7 + $0x8] sm:$0xff] }
 0x1bf   : > { %3170 = vmatpush3.msra.mxu1 %v3016_v5 }
 0x1c0   : > { %3171 = vmatprep.subr.mxu1 %v3031_v6 }
 0x1c1   : > { %3172 = vmatpush3.msra.mxu1 %v3015_v7 }
 0x1c2   : > { %3173 = vmatprep.subr.mxu1 %v3030_v8 }
 0x1c3   : > { %3174 = vmatpush3.msra.mxu1 %v3014_v9 }
 0x1c4   : > { %3175 = vmatprep.subr.mxu1 %v3029_v10  ;;  %v3033_v10 = vld [vmem:[%s4921_s5] ss:$0 sm:$0xff] }
 0x1c5   : > { %3176 = vmatpush3.msra.mxu1 %v3013_v11 }
 0x1c6   : > { %3177 = vmatprep.subr.mxu1 %v3028_v12 }
 0x1c7   : > { %3178 = vmatpush3.msra.mxu1 %v3012_v13 }
 0x1c8   : > { %3179 = vmatprep.subr.mxu1 %v3027_v14  ;;  %v1325_v14 = vld [vmem:[%s4922_s6] sm:$0xff] }
 0x1c9   : > { %3180 = vmatpush3.msra.mxu1 %v3011_v15  ;;  %v3050_v15 = vld [vmem:[%s4923_s7 + $0xf8] sm:$0xff] }
 0x1ca   : > { %3181 = vmatprep.subr.mxu1 %v3026_v16  ;;  %v3049_v16 = vld [vmem:[%s4923_s7 + $0xf0] sm:$0xff] }
 0x1cb   : > { %3182 = vmatpush3.msra.mxu1 %v3010_v17  ;;  %v3048_v17 = vld [vmem:[%s4923_s7 + $0xe8] sm:$0xff] }
 0x1cc   : > { %3183 = vmatprep.subr.mxu1 %v3025_v18  ;;  %v3047_v18 = vld [vmem:[%s4923_s7 + $0xe0] sm:$0xff] }
 0x1cd   : > { %3184 = vmatpush3.msra.mxu1 %v3009_v19  ;;  %v3046_v19 = vld [vmem:[%s4923_s7 + $0xd8] sm:$0xff] }
 0x1ce   : > { %3185 = vmatprep.subr.mxu1 %v3024_v20  ;;  %v3045_v20 = vld [vmem:[%s4923_s7 + $0xd0] sm:$0xff] }
 0x1cf   : > { %3186 = vmatpush3.msra.mxu1 %v3008_v21  ;;  %v3044_v21 = vld [vmem:[%s4923_s7 + $0xc8] sm:$0xff] }
 0x1d0   : > { %3187 = vmatprep.subr.mxu1 %v3023_v22  ;;  %v3043_v22 = vld [vmem:[%s4923_s7 + $0xc0] sm:$0xff] }
 0x1d1   : > { %3188 = vmatpush3.msra.mxu1 %v3007_v23  ;;  %v3042_v23 = vld [vmem:[%s4923_s7 + $0xb8] sm:$0xff] }
 0x1d2   : > { %3189 = vmatprep.subr.mxu1 %v3022_v24  ;;  %v3041_v24 = vld [vmem:[%s4923_s7 + $0xb0] sm:$0xff] }
 0x1d3   : > { %3190 = vmatpush3.msra.mxu1 %v3006_v25  ;;  %v3040_v25 = vld [vmem:[%s4923_s7 + $0xa8] sm:$0xff] }
 0x1d4   : > { %3191 = vmatprep.subr.mxu1 %v3021_v27  ;;  %v3038_v27 = vld [vmem:[%s4923_s7 + $0x98] sm:$0xff] }
 0x1d5   : > { %3192 = vmatpush3.msra.mxu1 %v3005_v29  ;;  %v3036_v29 = vld [vmem:[%s4923_s7 + $0x88] sm:$0xff] }
 0x1d6   : > { %3193 = vmatprep.subr.mxu1 %v3020_v31  ;;  %v3051_v31 = vld [vmem:[%s4922_s6 + $0x8] sm:$0xff] }
 0x1d7   : > { %3194 = vmatpush3.msra.mxu1 %v3004_v33  ;;  %v3068_v33 = vld [vmem:[%s4923_s7 + $0x178] sm:$0xff] }
 0x1d8   : > { %3195 = vmatprep.subr.mxu1 %v3019_v35  ;;  %v3067_v35 = vld [vmem:[%s4923_s7 + $0x170] sm:$0xff] }
 0x1d9   : > { %3196 = vmatpush3.msra.mxu1 %v3003_v37  ;;  %v3066_v37 = vld [vmem:[%s4923_s7 + $0x168] sm:$0xff] }
 0x1da   : > { %3197 = vmatprep.subr.mxu1 %v3018_v39  ;;  %v3064_v39 = vld [vmem:[%s4923_s7 + $0x158] sm:$0xff] }
 0x1db   : > { %3198 = vmatpush3.msra.mxu1 %v3002_v41  ;;  %v3062_v41 = vld [vmem:[%s4923_s7 + $0x148] sm:$0xff] }
 0x1dc   : > { %3199 = vmatprep.subr.mxu1 %v3017_v43  ;;  %v3060_v43 = vld [vmem:[%s4923_s7 + $0x138] sm:$0xff] }
 0x1dd   : > { %3200 = vmatpush3.msra.mxu1 %v3001_v45  ;;  %v3058_v45 = vld [vmem:[%s4923_s7 + $0x128] sm:$0xff] }
 0x1de   : > { %3413 = vmatprep.subr.mxu1 %v3807_v4 }
 0x27a   : > { %v1027_v46 = vpop.f32.mrf.mxu1 }
 0x27c   : > { %v1029_v47 = vpop.f32.mrf.mxu1 }
 0x27e   : > { %v1103_v48 = vpop.f32.mrf.mxu1 }
 0x27f   : > { %v1108_v51 = vmax.f32 %v1027_v46, %v1103_v48  ;;  %v3057_v46 = vld [vmem:[%s4923_s7 + $0x120] sm:$0xff]  ;;  %v3055_v48 = vld [vmem:[%s4923_s7 + $0x110] sm:$0xff] }
 0x280   : > { %v1105_v49 = vpop.f32.mrf.mxu1 }
 0x281   : > { %v1109_v50 = vmax.f32 %v1029_v47, %v1105_v49  ;;  %v3056_v47 = vld [vmem:[%s4923_s7 + $0x118] sm:$0xff]  ;;  %v3054_v49 = vld [vmem:[%s4923_s7 + $0x108] sm:$0xff] }
 0x283   : > { %1206 = vmatprep.mubr.f32.mxu0 %v1109_v50  ;;  %1309 = vmatprep.mubr.f32.mxu1 %v1109_v50  ;;  %v3053_v50 = vld [vmem:[%s4923_s7 + $0x100] sm:$0xff] }
 0x284   : > { %1207 = vmatmul.mubr.f32.vlgmr.msra.gmra.mxu0 %v1108_v51  ;;  %1310 = vmatmul.mubr.f32.vlgmr.msra.gmra.mxu1 %v1108_v51 }
 0x285   : > { %3375 = vmatprep.mubr.msk.f32.mxu0 %vm3808_vm1, %v3807_v4  ;;  %3445 = vmatprep.mubr.msk.f32.mxu1 %vm3808_vm1, %v3807_v4 }
 0x286   : > { %3414 = vmatpush3.msra.mxu1 %v1415_v52 }
 0x287   : > { %3415 = vmatprep.subr.mxu1 %v3807_v4 }
 0x288   : > { %3416 = vmatpush3.msra.mxu1 %v1414_v53 }
 0x289   : > { %3417 = vmatprep.subr.mxu1 %v3807_v4 }
 0x28a   : > { %3418 = vmatpush3.msra.mxu1 %v1413_v54 }
 0x28b   : > { %3419 = vmatprep.subr.mxu1 %v3807_v4 }
 0x28c   : > { %3420 = vmatpush3.msra.mxu1 %v1412_v55 }
 0x28d   : > { %3421 = vmatprep.subr.mxu1 %v3807_v4 }
 0x28e   : > { %3422 = vmatpush3.msra.mxu1 %v1411_v56 }
 0x28f   : > { %3423 = vmatprep.subr.mxu1 %v3807_v4 }
 0x290   : > { %3424 = vmatpush3.msra.mxu1 %v1410_v57 }
 0x291   : > { %3425 = vmatprep.subr.mxu1 %v3807_v4 }
 0x292   : > { %3426 = vmatpush3.msra.mxu1 %v1409_v58 }
 0x293   : > { %3427 = vmatprep.subr.mxu1 %v3807_v4 }
 0x294   : > { %3428 = vmatpush3.msra.mxu1 %v1408_v59 }
 0x295   : > { %3429 = vmatprep.subr.mxu1 %v3807_v4 }
 0x296   : > { %3430 = vmatpush3.msra.mxu1 %v1407_v60  ;;  %v1736_v60 = vld [vmem:[%s4924_s8] sm:$0xf] }
 0x297   : > { %3431 = vmatprep.subr.mxu1 %v3807_v4 }
 0x298   : > { %3432 = vmatpush3.msra.mxu1 %v1406_v61 }
 0x299   : > { %3433 = vmatprep.subr.mxu1 %v3807_v4 }
 0x29a   : > { %3434 = vmatpush3.msra.mxu1 %v1405_v62  ;;  %v3070_v62 = vld [vmem:[%s4924_s8 + $0x4] sm:$0xf] }
 0x29b   : > { %3435 = vmatprep.subr.mxu1 %v3807_v4 }
 0x29c   : > { %3436 = vmatpush3.msra.mxu1 %v1404_v63  ;;  %v1889_v63 = vld [vmem:[%s4925_s9 + $0x18] sm:$0xff] }
 0x29d   : > { %3437 = vmatprep.subr.mxu1 %v3807_v4 }
 0x29e   : > { %3438 = vmatpush3.msra.mxu1 %v1403_v0  ;;  %v1888_v0 = vld [vmem:[%s4925_s9 + $0x10] sm:$0xff] }
 0x29f   : > { %3439 = vmatprep.subr.mxu1 %v3807_v4 }
 0x2a0   : > { %3440 = vmatpush3.msra.mxu1 %v1402_v1  ;;  %v1887_v1 = vld [vmem:[%s4925_s9 + $0x8] sm:$0xff] }
 0x2a1   : > { %3441 = vmatprep.subr.mxu1 %v3807_v4 }
 0x2a2   : > { %3442 = vmatpush3.msra.mxu1 %v1401_v2  ;;  %v1886_v2 = vld [vmem:[%s4925_s9] sm:$0xff] }
 0x2a3   : > { %3443 = vmatprep.subr.mxu1 %v3807_v4 }
 0x2a4   : > { %3444 = vmatpush3.msra.mxu1 %v1400_v32 }
 0x2a5   : > { %3453 = vmatprep.subr.mxu1 %v3807_v4 }
 0x344   : > { %v3166_v3 = vpop.f32.mrf.mxu0  ;;  %v3201_v5 = vpop.f32.mrf.mxu1 }
 0x346   : > { %v3167_v6 = vpop.f32.mrf.mxu0  ;;  %v3202_v7 = vpop.f32.mrf.mxu1 }
 0x347   : > { %v3168_v8 = vadd.f32 %v3167_v6, %v3166_v3  ;;  %v3203_v9 = vadd.f32 %v3202_v7, %v3201_v5 }
 0x349   : > { %v1315_v11 = vmax.f32 %v3168_v8, %v3203_v9  ;;  %v3076_v8 = vld [vmem:[%s4925_s9 + $0x38] sm:$0xff] }
 0x34b   : > { %v1323_v12 = vadd.f32 %v3033_v10, %v1315_v11  ;;  %v3075_v10 = vld [vmem:[%s4925_s9 + $0x30] sm:$0xff]  ;;  %v3074_v11 = vld [vmem:[%s4925_s9 + $0x28] sm:$0xff] }
 0x34d   : > { %v1324_v13 = vmax.f32 %v1323_v12, 0.0  ;;  %v3073_v12 = vld [vmem:[%s4925_s9 + $0x20] sm:$0xff] }
 0x34f   : > { %3374 = vmatpush3.msra.mxu0 %v1324_v13 }
 0x350   : > { %3376 = vmatmul.mubr.msk.f32.vlgmr.msra.gmra.mxu0 %vm1326_vm2, %v1325_v14  ;;  %3378 = vmatprep.subr.mxu0 %v3807_v4  ;;  %v2049_v14 = vld [vmem:[%s4927_s11] sm:$0xff] }
 0x351   : > { %3379 = vmatpush3.msra.mxu0 %v3050_v15  ;;  %3410 = vmatprep.mubr.msk.f32.mxu0 %vm3808_vm1, %v3807_v4  ;;  %v4512_v15 = vld [vmem:[%s4929_s13 + $0x78] sm:$0xff] }
 0x352   : > { %3380 = vmatprep.subr.mxu0 %v3807_v4 }
 0x353   : > { %3381 = vmatpush3.msra.mxu0 %v3049_v16  ;;  %v4519_v16 = vld [vmem:[%s4929_s13 + $0x70] sm:$0xff] }
 0x354   : > { %3382 = vmatprep.subr.mxu0 %v3807_v4 }
 0x355   : > { %3383 = vmatpush3.msra.mxu0 %v3048_v17  ;;  %v4526_v17 = vld [vmem:[%s4929_s13 + $0x68] sm:$0xff] }
 0x356   : > { %3384 = vmatprep.subr.mxu0 %v3807_v4 }
 0x357   : > { %3385 = vmatpush3.msra.mxu0 %v3047_v18  ;;  %v4533_v18 = vld [vmem:[%s4929_s13 + $0x60] sm:$0xff] }
 0x358   : > { %3386 = vmatprep.subr.mxu0 %v3807_v4 }
 0x359   : > { %3387 = vmatpush3.msra.mxu0 %v3046_v19  ;;  %v4540_v19 = vld [vmem:[%s4929_s13 + $0x58] sm:$0xff] }
 0x35a   : > { %3388 = vmatprep.subr.mxu0 %v3807_v4 }
 0x35b   : > { %3389 = vmatpush3.msra.mxu0 %v3045_v20  ;;  %v4547_v20 = vld [vmem:[%s4929_s13 + $0x50] sm:$0xff] }
 0x35c   : > { %3390 = vmatprep.subr.mxu0 %v3807_v4 }
 0x35d   : > { %3391 = vmatpush3.msra.mxu0 %v3044_v21  ;;  %v4554_v21 = vld [vmem:[%s4929_s13 + $0x48] sm:$0xff] }
 0x35e   : > { %3392 = vmatprep.subr.mxu0 %v3807_v4 }
 0x35f   : > { %3393 = vmatpush3.msra.mxu0 %v3043_v22  ;;  %v4561_v22 = vld [vmem:[%s4929_s13 + $0x40] sm:$0xff] }
 0x360   : > { %3394 = vmatprep.subr.mxu0 %v3807_v4 }
 0x361   : > { %3395 = vmatpush3.msra.mxu0 %v3042_v23  ;;  %v4568_v23 = vld [vmem:[%s4929_s13 + $0x38] sm:$0xff] }
 0x362   : > { %3396 = vmatprep.subr.mxu0 %v3807_v4 }
 0x363   : > { %3397 = vmatpush3.msra.mxu0 %v3041_v24  ;;  %v4575_v24 = vld [vmem:[%s4929_s13 + $0x30] sm:$0xff] }
 0x364   : > { %3398 = vmatprep.subr.mxu0 %v3807_v4 }
 0x365   : > { %3399 = vmatpush3.msra.mxu0 %v3040_v25  ;;  %v4582_v25 = vld [vmem:[%s4929_s13 + $0x28] sm:$0xff] }
 0x366   : > { %3400 = vmatprep.subr.mxu0 %v3807_v4 }
 0x367   : > { %3401 = vmatpush3.msra.mxu0 %v3039_v26  ;;  %v4589_v26 = vld [vmem:[%s4929_s13 + $0x20] sm:$0xff] }
 0x368   : > { %3402 = vmatprep.subr.mxu0 %v3807_v4 }
 0x369   : > { %3403 = vmatpush3.msra.mxu0 %v3038_v27  ;;  %v4596_v27 = vld [vmem:[%s4929_s13 + $0x18] sm:$0xff] }
 0x36a   : > { %3404 = vmatprep.subr.mxu0 %v3807_v4 }
 0x36b   : > { %3405 = vmatpush3.msra.mxu0 %v3037_v28 }
 0x36c   : > { %3406 = vmatprep.subr.mxu0 %v3807_v4 }
 0x36d   : > { %3407 = vmatpush3.msra.mxu0 %v3036_v29 }
 0x36e   : > { %3408 = vmatprep.subr.mxu0 %v3807_v4 }
 0x36f   : > { %3409 = vmatpush3.msra.mxu0 %v3035_v30 }
 0x370   : > { %3411 = vmatmul.mubr.f32.vlgmr.msra.gmra.mxu0 %v1324_v13  ;;  %3448 = vmatprep.subr.mxu0 %v3807_v4 }
 0x371   : > { %3449 = vmatpush3.msra.mxu0 %v1324_v13  ;;  %3450 = vmatprep.mubr.msk.f32.mxu0 %vm3808_vm1, %v3807_v4  ;;  %v2050_v13 = vld [vmem:[%s4927_s11 + $0x8] sm:$0xff] }
 0x372   : > { %3488 = vmatprep.subr.mxu0 %v3807_v4 }
 0x374   : > { %3451 = vmatmul.mubr.msk.f32.vlgmr.msra.gmra.mxu0 %vm1326_vm2, %v3051_v31  ;;  %v3078_v31 = vld [vmem:[%s4926_s10] ss:$0 sm:$0xff] }
 0x375   : > { %3490 = vmatprep.mubr.msk.f32.mxu0 %vm3808_vm1, %v3807_v4 }
 0x410   : > { %v1396_v34 = vpop.f32.mrf.mxu0 }
 0x411   : > { %3446 = vmatmul.mubr.f32.vlgmr.msra.gmra.mxu1 %v1396_v34 }
 0x412   : > { %v3377_v36 = vpop.f32.mrf.mxu0  ;;  %3454 = vmatpush3.msra.mxu1 %v3068_v33  ;;  %3485 = vmatprep.mubr.msk.f32.mxu1 %vm3808_vm1, %v3807_v4 }
 0x413   : > { %3455 = vmatprep.subr.mxu1 %v3807_v4  ;;  %v3082_v36 = vld [vmem:[%s4927_s11 + $0x18] sm:$0xff] }
 0x414   : > { %3456 = vmatpush3.msra.mxu1 %v3067_v35 }
 0x415   : > { %3457 = vmatprep.subr.mxu1 %v3807_v4 }
 0x416   : > { %3458 = vmatpush3.msra.mxu1 %v3066_v37  ;;  %v3081_v37 = vld [vmem:[%s4927_s11 + $0x10] sm:$0xff] }
 0x417   : > { %3459 = vmatprep.subr.mxu1 %v3807_v4 }
 0x418   : > { %3460 = vmatpush3.msra.mxu1 %v3065_v38  ;;  %v4616_v38 = vld [vmem:[%s4929_s13 + $0xf8] sm:$0xff] }
 0x419   : > { %3461 = vmatprep.subr.mxu1 %v3807_v4 }
 0x41a   : > { %3462 = vmatpush3.msra.mxu1 %v3064_v39  ;;  %v4623_v39 = vld [vmem:[%s4929_s13 + $0xf0] sm:$0xff] }
 0x41b   : > { %3463 = vmatprep.subr.mxu1 %v3807_v4 }
 0x41c   : > { %3464 = vmatpush3.msra.mxu1 %v3063_v40  ;;  %v4632_v40 = vld [vmem:[%s4929_s13 + $0xe8] sm:$0xff] }
 0x41d   : > { %3465 = vmatprep.subr.mxu1 %v3807_v4 }
 0x41e   : > { %3466 = vmatpush3.msra.mxu1 %v3062_v41  ;;  %v4639_v41 = vld [vmem:[%s4929_s13 + $0xe0] sm:$0xff] }
 0x41f   : > { %3467 = vmatprep.subr.mxu1 %v3807_v4 }
 0x420   : > { %3468 = vmatpush3.msra.mxu1 %v3061_v42  ;;  %v4646_v42 = vld [vmem:[%s4929_s13 + $0xd8] sm:$0xff] }
 0x421   : > { %3469 = vmatprep.subr.mxu1 %v3807_v4 }
 0x422   : > { %3470 = vmatpush3.msra.mxu1 %v3060_v43  ;;  %v4653_v43 = vld [vmem:[%s4929_s13 + $0xd0] sm:$0xff] }
 0x423   : > { %3471 = vmatprep.subr.mxu1 %v3807_v4 }
 0x424   : > { %3472 = vmatpush3.msra.mxu1 %v3059_v44  ;;  %v4660_v44 = vld [vmem:[%s4929_s13 + $0xc8] sm:$0xff] }
 0x425   : > { %3473 = vmatprep.subr.mxu1 %v3807_v4 }
 0x426   : > { %3474 = vmatpush3.msra.mxu1 %v3058_v45  ;;  %v4667_v45 = vld [vmem:[%s4929_s13 + $0xc0] sm:$0xff] }
 0x427   : > { %3475 = vmatprep.subr.mxu1 %v3807_v4 }
 0x428   : > { %3476 = vmatpush3.msra.mxu1 %v3057_v46  ;;  %v4674_v46 = vld [vmem:[%s4929_s13 + $0xb8] sm:$0xff] }
 0x429   : > { %3477 = vmatprep.subr.mxu1 %v3807_v4 }
 0x42a   : > { %3478 = vmatpush3.msra.mxu1 %v3056_v47  ;;  %v4681_v47 = vld [vmem:[%s4929_s13 + $0xb0] sm:$0xff] }
 0x42b   : > { %3479 = vmatprep.subr.mxu1 %v3807_v4 }
 0x42c   : > { %3480 = vmatpush3.msra.mxu1 %v3055_v48  ;;  %v4688_v48 = vld [vmem:[%s4929_s13 + $0xa8] sm:$0xff] }
 0x42d   : > { %3481 = vmatprep.subr.mxu1 %v3807_v4 }
 0x42e   : > { %3482 = vmatpush3.msra.mxu1 %v3054_v49  ;;  %v4695_v49 = vld [vmem:[%s4929_s13 + $0xa0] sm:$0xff] }
 0x42f   : > { %3483 = vmatprep.subr.mxu1 %v3807_v4 }
 0x430   : > { %v1499_v51 = vpop.f32.mrf.mxu0  ;;  %3484 = vmatpush3.msra.mxu1 %v3053_v50  ;;  %v4702_v50 = vld [vmem:[%s4929_s13 + $0x98] sm:$0xff] }
 0x431   : > { %3534 = vmatprep.subr.mxu1 %v3807_v4 }
 0x432   : > { %v3412_v52 = vpop.f32.mrf.mxu0 }
 0x433   : > { %v4716_v52 = vld [vmem:[%s4929_s13 + $0x90] sm:$0xff] }
 0x434   : > { %v1644_v53 = vpop.f32.mrf.mxu0 }
 0x435   : > { %3486 = vmatmul.mubr.f32.vlgmr.msra.gmra.mxu1 %v1644_v53  ;;  %v4725_v53 = vld [vmem:[%s4929_s13 + $0x8] sm:$0xff] }
 0x436   : > { %v3452_v54 = vpop.f32.mrf.mxu0  ;;  %3566 = vmatprep.mubr.msk.f32.mxu1 %vm3808_vm1, %v3807_v4  ;;  %3535 = vmatpush3.msra.mxu1 %v4512_v15 }
 0x437   : > { %3536 = vmatprep.subr.mxu1 %v3807_v4  ;;  %v4730_v54 = vld [vmem:[%s4929_s13 + $0x88] sm:$0xff] }
 0x438   : > { %3537 = vmatpush3.msra.mxu1 %v4519_v16 }
 0x439   : > { %3538 = vmatprep.subr.mxu1 %v3807_v4 }
 0x43a   : > { %3539 = vmatpush3.msra.mxu1 %v4526_v17 }
 0x43b   : > { %3540 = vmatprep.subr.mxu1 %v3807_v4 }
 0x43c   : > { %3541 = vmatpush3.msra.mxu1 %v4533_v18 }
 0x43d   : > { %3542 = vmatprep.subr.mxu1 %v3807_v4 }
 0x43e   : > { %3543 = vmatpush3.msra.mxu1 %v4540_v19 }
 0x43f   : > { %3544 = vmatprep.subr.mxu1 %v3807_v4 }
 0x440   : > { %3545 = vmatpush3.msra.mxu1 %v4547_v20 }
 0x441   : > { %3546 = vmatprep.subr.mxu1 %v3807_v4 }
 0x442   : > { %3547 = vmatpush3.msra.mxu1 %v4554_v21 }
 0x443   : > { %3548 = vmatprep.subr.mxu1 %v3807_v4 }
 0x444   : > { %3549 = vmatpush3.msra.mxu1 %v4561_v22 }
 0x445   : > { %3550 = vmatprep.subr.mxu1 %v3807_v4 }
 0x446   : > { %3551 = vmatpush3.msra.mxu1 %v4568_v23 }
 0x447   : > { %3552 = vmatprep.subr.mxu1 %v3807_v4 }
 0x448   : > { %3553 = vmatpush3.msra.mxu1 %v4575_v24 }
 0x449   : > { %3554 = vmatprep.subr.mxu1 %v3807_v4 }
 0x44a   : > { %3555 = vmatpush3.msra.mxu1 %v4582_v25 }
 0x44b   : > { %3556 = vmatprep.subr.mxu1 %v3807_v4 }
 0x44c   : > { %3557 = vmatpush3.msra.mxu1 %v4589_v26 }
 0x44d   : > { %3558 = vmatprep.subr.mxu1 %v3807_v4 }
 0x44e   : > { %3559 = vmatpush3.msra.mxu1 %v4596_v27 }
 0x44f   : > { %3560 = vmatprep.subr.mxu1 %v3807_v4 }
 0x4d1   : > { %v1569_v55 = vpop.f32.mrf.mxu1 }
 0x4d2   : > { %v1570_v57 = vadd.f32 %v1569_v55, %v1499_v51  ;;  %v4711_v51 = vld [vmem:[%s4929_s13 + $0x10] sm:$0xff]  ;;  %v4739_v55 = vld [vmem:[%s4929_s13] sm:$0xff] }
 0x4d3   : > { %v3447_v56 = vpop.f32.mrf.mxu1  ;;  %3561 = vmatpush3.msra.mxu1 %v4711_v51 }
 0x4d4   : > { %3562 = vmatprep.subr.mxu1 %v3807_v4  ;;  %v4744_v56 = vld [vmem:[%s4929_s13 + $0x80] sm:$0xff] }
 0x4d5   : > { %3563 = vmatpush3.msra.mxu1 %v4725_v53 }
 0x4d6   : > { %3564 = vmatprep.subr.mxu1 %v3807_v4 }
 0x4d7   : > { %3565 = vmatpush3.msra.mxu1 %v4739_v55 }
 0x4f5   : > { %v1731_v58 = vpop.f32.mrf.mxu1 }
 0x4f6   : > { %v1735_v59 = vadd.f32 %v1731_v58, %v1570_v57  ;;  %v3079_v57 = vld [vmem:[%s4928_s12] ss:$0 sm:$0xff] }
 0x4f7   : > { %v3487_v61 = vpop.f32.mrf.mxu1 }
 0x4f8   : > { %3489 = vmatpush3.msra.mxu0 %v1735_v59 }
 0x4f9   : > { %3491 = vmatmul.mubr.msk.f32.vlgmr.msra.gmra.mxu0 %vm1326_vm2, %v1736_v60  ;;  %3493 = vmatprep.subr.mxu0 %v3807_v4 }
 0x4fa   : > { %3494 = vmatpush3.msra.mxu0 %v1735_v59  ;;  %3495 = vmatprep.mubr.msk.f32.mxu0 %vm3808_vm1, %v3807_v4 }
 0x4fb   : > { %3498 = vmatprep.subr.mxu0 %v3807_v4 }
 0x4fd   : > { %3496 = vmatmul.mubr.msk.f32.vlgmr.msra.gmra.mxu0 %vm1326_vm2, %v3070_v62 }
 0x4fe   : > { %3499 = vmatpush3.msra.mxu0 %v1889_v63  ;;  %3506 = vmatprep.mubr.msk.f32.mxu0 %vm3808_vm1, %v3807_v4 }
 0x4ff   : > { %3500 = vmatprep.subr.mxu0 %v3807_v4 }
 0x500   : > { %3501 = vmatpush3.msra.mxu0 %v1888_v0 }
 0x501   : > { %3502 = vmatprep.subr.mxu0 %v3807_v4 }
 0x502   : > { %3503 = vmatpush3.msra.mxu0 %v1887_v1  ;;  %v3084_v1 = vld [vmem:[%s4930_s14 + $0x10] sm:$0xff] }
 0x503   : > { %3504 = vmatprep.subr.mxu0 %v3807_v4 }
 0x504   : > { %3505 = vmatpush3.msra.mxu0 %v1886_v2  ;;  %v2206_v2 = vld [vmem:[%s4930_s14] sm:$0xff] }
 0x505   : > { %3509 = vmatprep.subr.mxu0 %v3807_v4 }
 0x5b9   : > { %v1806_v3 = vpop.f32.mrf.mxu0 }
 0x5bb   : > { %v3492_v5 = vpop.f32.mrf.mxu0 }
 0x5bd   : > { %v1881_v6 = vpop.f32.mrf.mxu0 }
 0x5be   : > { %v1885_v7 = vmax.f32 %v1806_v3, %v1881_v6  ;;  %v3085_v6 = vld [vmem:[%s4930_s14 + $0x18] sm:$0xff] }
 0x5bf   : > { %v3497_v9 = vpop.f32.mrf.mxu0 }
 0x5c0   : > { %3507 = vmatmul.mubr.msk.f32.vlgmr.msra.gmra.mxu0 %vm1890_vm3, %v1885_v7 }
 0x5c1   : > { %3510 = vmatpush3.msra.mxu0 %v3076_v8  ;;  %3517 = vmatprep.mubr.msk.f32.mxu0 %vm3808_vm1, %v3807_v4 }
 0x5c2   : > { %3511 = vmatprep.subr.mxu0 %v3807_v4 }
 0x5c3   : > { %3512 = vmatpush3.msra.mxu0 %v3075_v10 }
 0x5c4   : > { %3513 = vmatprep.subr.mxu0 %v3807_v4 }
 0x5c5   : > { %3514 = vmatpush3.msra.mxu0 %v3074_v11  ;;  %v3108_v11 = vld [vmem:[%s4930_s14 + $0x20] sm:$0xff] }
 0x5c6   : > { %3515 = vmatprep.subr.mxu0 %v3807_v4 }
 0x5c7   : > { %3516 = vmatpush3.msra.mxu0 %v3073_v12 }
 0x5c8   : > { %3518 = vmatmul.mubr.msk.f32.vlgmr.msra.gmra.mxu0 %vm1890_vm3, %v1885_v7  ;;  %3520 = vmatprep.subr.mxu0 %v3807_v4  ;;  %v2207_v7 = vld [vmem:[%s4930_s14 + $0x8] sm:$0xff] }
 0x5c9   : > { %3524 = vmatprep.mubr.msk.f32.mxu0 %vm3808_vm1, %v3807_v4  ;;  %3521 = vmatpush3.msra.mxu0 %v2050_v13 }
 0x5ca   : > { %3522 = vmatprep.subr.mxu0 %v3807_v4 }
 0x5cb   : > { %3523 = vmatpush3.msra.mxu0 %v2049_v14 }
 0x5cc   : > { %3527 = vmatprep.subr.mxu0 %v3807_v4 }
 0x680   : > { %v1960_v28 = vpop.f32.mrf.mxu0 }
 0x682   : > { %v3508_v29 = vpop.f32.mrf.mxu0 }
 0x683   : > { %v3118_v29 = vld [vmem:[%s4931_s15] ss:$0 sm:$0xff] }
 0x688   : > { %v2035_v30 = vpop.f32.mrf.mxu0 }
 0x689   : > { %v2039_v32 = vmax.f32 %v1960_v28, %v2035_v30 }
 0x68a   : > { %v3519_v33 = vpop.f32.mrf.mxu0 }
 0x68b   : > { %v2047_v34 = vadd.f32 %v3078_v31, %v2039_v32 }
 0x68d   : > { %v2048_v35 = vmax.f32 %v2047_v34, 0.0 }
 0x68f   : > { %3525 = vmatmul.mubr.msk.f32.vlgmr.msra.gmra.mxu0 %vm524_vm0, %v2048_v35 }
 0x690   : > { %3528 = vmatpush3.msra.mxu0 %v3082_v36  ;;  %3531 = vmatprep.mubr.msk.f32.mxu0 %vm3808_vm1, %v3807_v4 }
 0x691   : > { %3529 = vmatprep.subr.mxu0 %v3807_v4 }
 0x692   : > { %3530 = vmatpush3.msra.mxu0 %v3081_v37 }
 0x693   : > { %3532 = vmatmul.mubr.msk.f32.vlgmr.msra.gmra.mxu0 %vm524_vm0, %v2048_v35  ;;  %3569 = vmatprep.subr.mxu0 %v3807_v4 }
 0x694   : > { %3570 = vmatpush3.msra.mxu0 %v4616_v38  ;;  %3601 = vmatprep.mubr.msk.f32.mxu0 %vm3808_vm1, %v3807_v4 }
 0x695   : > { %3571 = vmatprep.subr.mxu0 %v3807_v4 }
 0x696   : > { %3572 = vmatpush3.msra.mxu0 %v4623_v39 }
 0x697   : > { %3573 = vmatprep.subr.mxu0 %v3807_v4 }
 0x698   : > { %3574 = vmatpush3.msra.mxu0 %v4632_v40 }
 0x699   : > { %3575 = vmatprep.subr.mxu0 %v3807_v4 }
 0x69a   : > { %3576 = vmatpush3.msra.mxu0 %v4639_v41 }
 0x69b   : > { %3577 = vmatprep.subr.mxu0 %v3807_v4 }
 0x69c   : > { %3578 = vmatpush3.msra.mxu0 %v4646_v42 }
 0x69d   : > { %3579 = vmatprep.subr.mxu0 %v3807_v4 }
 0x69e   : > { %3580 = vmatpush3.msra.mxu0 %v4653_v43 }
 0x69f   : > { %3581 = vmatprep.subr.mxu0 %v3807_v4 }
 0x6a0   : > { %3582 = vmatpush3.msra.mxu0 %v4660_v44 }
 0x6a1   : > { %3583 = vmatprep.subr.mxu0 %v3807_v4 }
 0x6a2   : > { %3584 = vmatpush3.msra.mxu0 %v4667_v45 }
 0x6a3   : > { %3585 = vmatprep.subr.mxu0 %v3807_v4 }
 0x6a4   : > { %3586 = vmatpush3.msra.mxu0 %v4674_v46 }
 0x6a5   : > { %3587 = vmatprep.subr.mxu0 %v3807_v4 }
 0x6a6   : > { %3588 = vmatpush3.msra.mxu0 %v4681_v47 }
 0x6a7   : > { %3589 = vmatprep.subr.mxu0 %v3807_v4 }
 0x6a8   : > { %3590 = vmatpush3.msra.mxu0 %v4688_v48 }
 0x6a9   : > { %3591 = vmatprep.subr.mxu0 %v3807_v4 }
 0x6aa   : > { %3592 = vmatpush3.msra.mxu0 %v4695_v49 }
 0x6ab   : > { %3593 = vmatprep.subr.mxu0 %v3807_v4 }
 0x6ac   : > { %3594 = vmatpush3.msra.mxu0 %v4702_v50 }
 0x6ad   : > { %3595 = vmatprep.subr.mxu0 %v3807_v4 }
 0x6ae   : > { %3596 = vmatpush3.msra.mxu0 %v4716_v52 }
 0x6af   : > { %3597 = vmatprep.subr.mxu0 %v3807_v4 }
 0x6b0   : > { %3598 = vmatpush3.msra.mxu0 %v4730_v54 }
 0x6b1   : > { %3599 = vmatprep.subr.mxu0 %v3807_v4 }
 0x6b2   : > { %3600 = vmatpush3.msra.mxu0 %v4744_v56 }
 0x74f   : > { %v2127_v58 = vpop.f32.mrf.mxu0 }
 0x750   : > { %v2128_v59 = vadd.f32 %v3079_v57, %v2127_v58 }
 0x751   : > { %v3526_v60 = vpop.f32.mrf.mxu0 }
 0x752   : > { %v2131_v61 = vmax.f32 %v2128_v59, 0.0 }
 0x753   : > { %v2201_v62 = vpop.f32.mrf.mxu0 }
 0x754   : > { %v4751_v63 = vadd.f32 %v3079_v57, %v2201_v62  ;;  %3567 = vmatmul.mubr.f32.vlgmr.msra.gmra.mxu1 %v2131_v61  ;;  %3602 = vmatmul.mubr.f32.vlgmr.msra.gmra.mxu0 %v2131_v61 }
 0x755   : > { %v3533_v0 = vpop.f32.mrf.mxu0  ;;  %3606 = vmatprep.mubr.msk.f32.mxu1 %vm2384_vm4, %v3084_v1  ;;  %3611 = vmatprep.mubr.msk.f32.mxu0 %vm2384_vm4, %v2206_v2 }
 0x756   : > { %v2205_v10 = vmax.f32 %v4751_v63, 0.0 }
 0x814   : > { %v2290_v3 = vpop.f32.mrf.mxu1  ;;  %v2380_v5 = vpop.f32.mrf.mxu0 }
 0x815   : > { %3604 = vmatprep.subr.msk.mxu1 %vm2391_vm5, %v2380_v5  ;;  %3609 = vmatprep.subr.msk.mxu0 %vm2391_vm5, %v2290_v3 }
 0x816   : > { %v3568_v8 = vpop.f32.mrf.mxu1  ;;  %v3603_v9 = vpop.f32.mrf.mxu0  ;;  %3605 = vmatpush3.msk.msra.mxu1 %vm2391_vm5, %v2380_v5  ;;  %3610 = vmatpush3.msk.msra.mxu0 %vm2391_vm5, %v2290_v3 }
 0x817   : > { %3607 = vmatmul.mubr.msk.f32.vlgmr.msra.gmra.mxu1 %vm2384_vm4, %v3085_v6  ;;  %3612 = vmatmul.mubr.msk.f32.vlgmr.msra.gmra.mxu0 %vm2384_vm4, %v2207_v7 }
 0x818   : > { %3614 = vmatprep.subr.mxu1 %v3807_v4  ;;  %3646 = vmatprep.mubr.msk.f32.mxu1 %vm3808_vm1, %v3807_v4 }
 0x819   : > { %3615 = vmatpush3.msra.mxu1 %v4512_v15  ;;  %3651 = vmatprep.mubr.msk.f32.mxu0 %vm2384_vm4, %v3108_v11 }
 0x81a   : > { %3616 = vmatprep.subr.mxu1 %v3807_v4 }
 0x81b   : > { %3617 = vmatpush3.msra.mxu1 %v4519_v16 }
 0x81c   : > { %3618 = vmatprep.subr.mxu1 %v3807_v4 }
 0x81d   : > { %3619 = vmatpush3.msra.mxu1 %v4526_v17  ;;  %v3109_v17 = vld [vmem:[%s4930_s14 + $0x28] sm:$0xff] }
 0x81e   : > { %3620 = vmatprep.subr.mxu1 %v3807_v4 }
 0x81f   : > { %3621 = vmatpush3.msra.mxu1 %v4533_v18 }
 0x820   : > { %3622 = vmatprep.subr.mxu1 %v3807_v4 }
 0x821   : > { %3623 = vmatpush3.msra.mxu1 %v4540_v19  ;;  %v3113_v19 = vld [vmem:[%s4930_s14 + $0x30] sm:$0xff] }
 0x822   : > { %3624 = vmatprep.subr.mxu1 %v3807_v4 }
 0x823   : > { %3625 = vmatpush3.msra.mxu1 %v4547_v20 }
 0x824   : > { %3626 = vmatprep.subr.mxu1 %v3807_v4 }
 0x825   : > { %3627 = vmatpush3.msra.mxu1 %v4554_v21 }
 0x826   : > { %3628 = vmatprep.subr.mxu1 %v3807_v4 }
 0x827   : > { %3629 = vmatpush3.msra.mxu1 %v4561_v22 }
 0x828   : > { %3630 = vmatprep.subr.mxu1 %v3807_v4 }
 0x829   : > { %3631 = vmatpush3.msra.mxu1 %v4568_v23 }
 0x82a   : > { %3632 = vmatprep.subr.mxu1 %v3807_v4 }
 0x82b   : > { %3633 = vmatpush3.msra.mxu1 %v4575_v24 }
 0x82c   : > { %3634 = vmatprep.subr.mxu1 %v3807_v4 }
 0x82d   : > { %3635 = vmatpush3.msra.mxu1 %v4582_v25 }
 0x82e   : > { %3636 = vmatprep.subr.mxu1 %v3807_v4 }
 0x82f   : > { %3637 = vmatpush3.msra.mxu1 %v4589_v26 }
 0x830   : > { %3638 = vmatprep.subr.mxu1 %v3807_v4 }
 0x831   : > { %3639 = vmatpush3.msra.mxu1 %v4596_v27 }
 0x832   : > { %3640 = vmatprep.subr.mxu1 %v3807_v4 }
 0x833   : > { %3641 = vmatpush3.msra.mxu1 %v4711_v51 }
 0x834   : > { %3642 = vmatprep.subr.mxu1 %v3807_v4 }
 0x835   : > { %3643 = vmatpush3.msra.mxu1 %v4725_v53 }
 0x836   : > { %3644 = vmatprep.subr.mxu1 %v3807_v4 }
 0x837   : > { %3645 = vmatpush3.msra.mxu1 %v4739_v55 }
 0x838   : > { %3647 = vmatmul.mubr.f32.vlgmr.msra.gmra.mxu1 %v2205_v10 }
 0x839   : > { %3691 = vmatprep.mubr.msk.f32.mxu1 %vm2384_vm4, %v3113_v19 }
 0x8d7   : > { %v3608_v12 = vpop.f32.mrf.mxu1  ;;  %v3613_v13 = vpop.f32.mrf.mxu0 }
 0x8d8   : > { %v2551_v14 = vadd.f32 %v3613_v13, %v3608_v12 }
 0x8d9   : > { %v2461_v15 = vpop.f32.mrf.mxu1  ;;  %v2545_v20 = vpop.f32.mrf.mxu0 }
 0x8da   : > { %v2546_v22 = vadd.f32 %v2545_v20, %v2461_v15 }
 0x8f8   : > { %v2623_v16 = vpop.f32.mrf.mxu1 }
 0x8f9   : > { %3649 = vmatprep.subr.msk.mxu0 %vm2391_vm5, %v2623_v16 }
 0x8fa   : > { %v3648_v18 = vpop.f32.mrf.mxu1  ;;  %3650 = vmatpush3.msk.msra.mxu0 %vm2391_vm5, %v2623_v16 }
 0x8fb   : > { %3652 = vmatmul.mubr.msk.f32.vlgmr.msra.gmra.mxu0 %vm2384_vm4, %v3109_v17  ;;  %3654 = vmatprep.subr.mxu0 %v3807_v4 }
 0x8fc   : > { %3655 = vmatpush3.msra.mxu0 %v4616_v38  ;;  %3686 = vmatprep.mubr.msk.f32.mxu0 %vm3808_vm1, %v3807_v4 }
 0x8fd   : > { %3656 = vmatprep.subr.mxu0 %v3807_v4 }
 0x8fe   : > { %3657 = vmatpush3.msra.mxu0 %v4623_v39 }
 0x8ff   : > { %3658 = vmatprep.subr.mxu0 %v3807_v4 }
 0x900   : > { %3659 = vmatpush3.msra.mxu0 %v4632_v40 }
 0x901   : > { %3660 = vmatprep.subr.mxu0 %v3807_v4 }
 0x902   : > { %3661 = vmatpush3.msra.mxu0 %v4639_v41 }
 0x903   : > { %3662 = vmatprep.subr.mxu0 %v3807_v4 }
 0x904   : > { %3663 = vmatpush3.msra.mxu0 %v4646_v42 }
 0x905   : > { %3664 = vmatprep.subr.mxu0 %v3807_v4 }
 0x906   : > { %3665 = vmatpush3.msra.mxu0 %v4653_v43 }
 0x907   : > { %3666 = vmatprep.subr.mxu0 %v3807_v4 }
 0x908   : > { %3667 = vmatpush3.msra.mxu0 %v4660_v44 }
 0x909   : > { %3668 = vmatprep.subr.mxu0 %v3807_v4 }
 0x90a   : > { %3669 = vmatpush3.msra.mxu0 %v4667_v45 }
 0x90b   : > { %3670 = vmatprep.subr.mxu0 %v3807_v4 }
 0x90c   : > { %3671 = vmatpush3.msra.mxu0 %v4674_v46 }
 0x90d   : > { %3672 = vmatprep.subr.mxu0 %v3807_v4 }
 0x90e   : > { %3673 = vmatpush3.msra.mxu0 %v4681_v47 }
 0x90f   : > { %3674 = vmatprep.subr.mxu0 %v3807_v4 }
 0x910   : > { %3675 = vmatpush3.msra.mxu0 %v4688_v48 }
 0x911   : > { %3676 = vmatprep.subr.mxu0 %v3807_v4 }
 0x912   : > { %3677 = vmatpush3.msra.mxu0 %v4695_v49 }
 0x913   : > { %3678 = vmatprep.subr.mxu0 %v3807_v4 }
 0x914   : > { %3679 = vmatpush3.msra.mxu0 %v4702_v50 }
 0x915   : > { %3680 = vmatprep.subr.mxu0 %v3807_v4 }
 0x916   : > { %3681 = vmatpush3.msra.mxu0 %v4716_v52 }
 0x917   : > { %3682 = vmatprep.subr.mxu0 %v3807_v4 }
 0x918   : > { %3683 = vmatpush3.msra.mxu0 %v4730_v54 }
 0x919   : > { %3684 = vmatprep.subr.mxu0 %v3807_v4  ;;  %v3114_v4 = vld [vmem:[%s4930_s14 + $0x38] sm:$0xff] }
 0x91a   : > { %3685 = vmatpush3.msra.mxu0 %v4744_v56 }
 0x91b   : > { %3687 = vmatmul.mubr.f32.vlgmr.msra.gmra.mxu0 %v2205_v10 }
 0x9bb   : > { %v3653_v21 = vpop.f32.mrf.mxu0 }
 0x9bc   : > { %v2712_v23 = vadd.f32 %v3653_v21, %v2551_v14 }
 0x9bd   : > { %v2702_v24 = vpop.f32.mrf.mxu0 }
 0x9be   : > { %v2711_v25 = vadd.f32 %v2702_v24, %v2546_v22 }
 0x9db   : > { %v2782_v26 = vpop.f32.mrf.mxu0 }
 0x9dc   : > { %3689 = vmatprep.subr.msk.mxu1 %vm2391_vm5, %v2782_v26 }
 0x9dd   : > { %v3688_v27 = vpop.f32.mrf.mxu0  ;;  %3690 = vmatpush3.msk.msra.mxu1 %vm2391_vm5, %v2782_v26 }
 0x9de   : > { %3692 = vmatmul.mubr.msk.f32.vlgmr.msra.gmra.mxu1 %vm2384_vm4, %v3114_v4 }
 0xa9e   : > { %v3693_v28 = vpop.f32.mrf.mxu1 }
 0xa9f   : > { %v2871_v30 = vadd.f32 %v3693_v28, %v2712_v23 }
 0xaa0   : > { %v2861_v31 = vpop.f32.mrf.mxu1 }
 0xaa1   : > { %v2880_v32 = vadd.f32 %v3118_v29, %v2871_v30  ;;  %v2870_v33 = vadd.f32 %v2861_v31, %v2711_v25 }
 0xaa3   : > { %v2882_v34 = vsub.f32 0.0, %v2880_v32  ;;  %v2879_v35 = vadd.f32 %v3118_v29, %v2870_v33 }
 0xaa5   : > { %v2885_v36 = vmul.f32 1.442695, %v2882_v34  ;;  %v2881_v37 = vsub.f32 0.0, %v2879_v35 }
 0xaa7   : > { %3737 = vpow2.f32 %v2885_v36  ;;  %v2883_v38 = vmul.f32 1.442695, %v2881_v37 }
 0xaa9   : > { %3739 = vpow2.f32 %v2883_v38 }
 0xab4   : > { %v3738_v39 = vpop.eup %3737 }
 0xab5   : > { %v2888_v40 = vadd.f32 1.0, %v3738_v39 }
 0xab6   : > { %v3740_v41 = vpop.eup %3739 }
 0xab7   : > { %3741 = vrcp.f32 %v2888_v40  ;;  %v2887_v42 = vadd.f32 1.0, %v3740_v41 }
 0xab9   : > { %3743 = vrcp.f32 %v2887_v42 }
 0xac4   : > { %v3742_v43 = vpop.eup %3741 }
 0xac5   : > { %2894 = vst.msk [vmem:[%s514_s19 + $0x8] sm:$0xff] %vm524_vm0, %v3742_v43 }
 0xac6   : > { %v3744_v44 = vpop.eup %3743 }
 0xac7   : > { %2893 = vst.msk [vmem:[%s514_s19] sm:$0xff] %vm524_vm0, %v3744_v44 }
 0xac8   : > { %3758 = shalt.err (!%p3755_p3)
}
 0xac9   : > { %s3759_s23 = scalar_lea.hbm %s4870_s26, 256  ;;  %s3763_s20 = scalar_lea.hbm %s4932_s16, 512 }
 0xaca   : > { %p3760_p4 = scmp.ne.s32.totalorder %s4870_s26, %s3759_s23  ;;  %p3764_p9 = scmp.lt.s32.totalorder %s4870_s26, %s4932_s16 }
 0xacb   : > { %p3765_p10 = scmp.lt.s32.totalorder %s3763_s20, %s3759_s23 }
 0xacc   : > { %p3761_p7 = pnand %p3760_p4, %p3935_p5 }
 0xacd   : > { %p3766_p11 = por %p3765_p10, %p3764_p9 }
 0xace   : > { %p3762_p8 = pneg %p3761_p7 }
 0xad0   : > { %p3767_p12 = pnand %p3766_p11, %p3762_p8 }
 0xad2   : > { %3770 = shalt.err (!%p3767_p12)
}
 0xad3   : > { %s3810_s25 = smov 128   ;;  %s3811_s30 = smov 8  }
 0xad4   : > { %3694 = dma.vmem_to_hbm [thread:$0]  (%p3935_p5), %s4872_s27, 256, %s4870_s26, %s4876_s28, %s3810_s25, %s3810_s25, %s3811_s30  }
 0xad5 PF: > { %p3700_p13 = scmp.ge.s32.totalorder %s3805_s24, 2  ;;  %s2924_s19 = sand.u32 1, %s3793_s21  }
 0xad6   : > { %s2925_s1 = scalar_lea.sflag [#allocation3], %s2924_s19 }
 0xad7   : > { %p3697_p0 = pnand %p3700_p13, %p3939_p6 }
 0xad9   : > { %p3698_p1 = pneg %p3697_p0 }
 0xadb   : > { %3788 = dma.done.wait (%p3698_p1), %s2925_s1, 256  }
 0xadc   : > { %3790 = vsyncadd (%p3698_p1), %s2925_s1, 4294967040  ;;  %s4948_s24 = sld [smem:[#allocation6_spill]]  ;;  %s4951_s21 = smov %s3797_s22 }
 0xadd   : > { %s4949_s23 = sld [smem:[#allocation5_spill]] }
 0xade   : > { %s4950_s17 = sld [smem:[#allocation7_spill]] }
 0xae2   : > { %p26_p2 = scmp.ge.s32.totalorder %s4948_s24, 4  }
 0xae3   : > { %s4952_s22 = smov %s4949_s23 }
 0xae4   : > { %s4953_s23 = smov %s4950_s17  ;;  %28 = sbr.rel (!%p26_p2) target bundleno = 6 (0x6), region = 134 }
 0xae9   :  { %2930 = vsyncpa [#allocation3], 1 }
 0xaea   :  { %2932 = vsyncpa [#allocation3 + $0x1], 1 }

</bundles_post_ra>
